<compile_context>
chip_gen: v7x
topology: tpu7x:2x2x1
jax: 0.10.0
libtpu: 0.0.40
codegen_flags: <defaults>
</compile_context>

<pallas_src>
import functools
from typing import NamedTuple

import jax
import jax.numpy as jnp
from jax.experimental import pallas as pl
from jax.experimental.pallas import tpu as pltpu

_LANE = 128
_SUBLANE = 8
_K_ALIGN = 256                       # v6e/v7x MXU: keep big K 256-aligned
_WEIGHT_SINGLE_BUFFER_BYTES = 4 << 20  # only force Buffered(1) when it matters


def _round_up(n, m):
    return ((n + m - 1) // m) * m


def _cdiv(a, b):
    return -(-a // b)


class EncoderMeta(NamedTuple):
    D: int
    C: int
    H: int
    L: int
    Dp: int
    Cp: int
    Hp: int
    head_stride: int
    Np: int
    folded: bool


# --------------------------------------------------------------------------
# Kernels
# --------------------------------------------------------------------------
def _encoder_kernel_folded(x_ref, w1_ref, b1_ref, w2_ref, b2_ref, out_ref):
    # fc1 (y_soft rides in x's pad columns), f32 MXU accumulation.
    h = jnp.dot(x_ref[...], w1_ref[...], preferred_element_type=jnp.float32)
    h = jnp.maximum(h + b1_ref[...], 0.0)                       # bias+ReLU (VPU)
    # Fused heads: one dot -> lane-dense [mu | logvar] slab.
    out = jnp.dot(h.astype(w2_ref.dtype), w2_ref[...],
                  preferred_element_type=jnp.float32)
    out_ref[...] = (out + b2_ref[...]).astype(out_ref.dtype)


def _encoder_kernel_split(x_ref, y_ref, w1x_ref, w1y_ref, b1_ref, w2_ref,
                          b2_ref, out_ref):
    # Split-dot fc1 keeps an already 256-aligned x un-copied (no concat).
    h = jnp.dot(x_ref[...], w1x_ref[...], preferred_element_type=jnp.float32)
    h = h + jnp.dot(y_ref[...], w1y_ref[...],
                    preferred_element_type=jnp.float32)
    h = jnp.maximum(h + b1_ref[...], 0.0)
    out = jnp.dot(h.astype(w2_ref.dtype), w2_ref[...],
                  preferred_element_type=jnp.float32)
    out_ref[...] = (out + b2_ref[...]).astype(out_ref.dtype)


# --------------------------------------------------------------------------
# One-time weight packing (hoisted out of the forward)
# --------------------------------------------------------------------------
def pack_weights(params, input_dim, *, compute_dtype=jnp.bfloat16):
    """Pad/split/fuse/cast the Linear weights ONCE per params."""
    f32 = jnp.float32
    w1 = jnp.asarray(params["w1"], f32)           # (D + C, H)
    D = int(input_dim)
    C = w1.shape[0] - D
    H = w1.shape[1]
    L = params["wmu"].shape[1]

    Dp = _round_up(D, _K_ALIGN)
    folded = (Dp - D) >= C                        # fold y into x's pad columns
    Cp = 0 if folded else _round_up(C, _LANE)
    Hp = _round_up(H, _LANE)                      # 400 -> 512
    head_stride = _round_up(L, _LANE)             # each head on its own slab
    Np = 2 * head_stride

    if folded:
        w1x = jnp.zeros((Dp, Hp), f32).at[:D + C, :H].set(w1)
        weights = {}
    else:
        w1x = jnp.zeros((Dp, Hp), f32).at[:D, :H].set(w1[:D])
        w1y = jnp.zeros((Cp, Hp), f32).at[:C, :H].set(w1[D:])
        weights = {"w1y": w1y.astype(compute_dtype)}

    b1 = jnp.zeros((1, Hp), f32).at[:, :H].set(
        jnp.asarray(params["b1"], f32).reshape(1, H))
    w2 = jnp.zeros((Hp, Np), f32)
    w2 = (w2.at[:H, :L].set(jnp.asarray(params["wmu"], f32))
             .at[:H, head_stride:head_stride + L]
             .set(jnp.asarray(params["wlv"], f32)))
    b2 = jnp.zeros((1, Np), f32)
    b2 = (b2.at[:, :L].set(jnp.asarray(params["bmu"], f32).reshape(1, L))
             .at[:, head_stride:head_stride + L]
             .set(jnp.asarray(params["blv"], f32).reshape(1, L)))

    weights.update({
        "w1x": w1x.astype(compute_dtype),
        "b1": b1,                                 # biases stay f32 (added to f32 acc)
        "w2": w2.astype(compute_dtype),
        "b2": b2,
    })
    meta = EncoderMeta(D, C, H, L, Dp, Cp, Hp, head_stride, Np, folded)
    return weights, meta


# --------------------------------------------------------------------------
# Tiling / VMEM planning
# --------------------------------------------------------------------------
def _plan(B, meta, in_itemsize, w_itemsize, *, tile_b_max, min_grid_tiles,
          vmem_budget_bytes):
    Dp, Cp, Hp, Np = meta.Dp, meta.Cp, meta.Hp, meta.Np
    weight_bytes = (Dp * Hp + Cp * Hp + Hp * Np) * w_itemsize + (Hp + Np) * 4
    single_buffer = weight_bytes >= _WEIGHT_SINGLE_BUFFER_BYTES
    w_resident = weight_bytes * (1 if single_buffer else 2)
    # Per batch-row VMEM: double-buffered x/y tiles, double-buffered f32 out,
    # plus roughly f32 intermediates (h and the pre-store slab).
    per_row = 2 * (Dp + Cp) * in_itemsize + 2 * Np * 4 + (Hp + Np) * 4
    avail = vmem_budget_bytes - w_resident - (2 << 20)
    if avail < per_row * _SUBLANE:
        # TODO(synk): K-split reduction grid (stream fc1 weight) once the
        # fully VMEM-resident weight layout stops fitting (very large D).
        tile_cap = _SUBLANE
    else:
        tile_cap = max(_SUBLANE,
                       min(tile_b_max, (avail // per_row) // _SUBLANE * _SUBLANE))
    # >= min_grid_tiles tiles (megacore + pipelining) with a near-full last
    # tile: avoids the round_up(B, tile_b) padding blow-up.
    n_tiles = max(min_grid_tiles, _cdiv(B, tile_cap))
    tile_b = min(tile_cap, max(_SUBLANE, _round_up(_cdiv(B, n_tiles), _SUBLANE)))
    Bp = _round_up(max(B, tile_b), tile_b)
    needed = w_resident + tile_b * per_row + (2 << 20)
    vmem_limit = int(min(100 << 20, max(32 << 20, needed)))
    return tile_b, Bp, vmem_limit, single_buffer, weight_bytes


# --------------------------------------------------------------------------
# Forward
# --------------------------------------------------------------------------
@functools.partial(jax.jit,
                   static_argnames=("meta", "tile_b_max", "vmem_budget_bytes"))
def res_encoder_forward(x, y_soft, weights, meta, *, tile_b_max=512,
                        vmem_budget_bytes=48 << 20):
    """x: [B, C, H, W] f32, y_soft: [B, num_classes] f32 -> (mu, logvar) f32."""
    B = x.shape[0]
    x_flat = x.reshape(B, -1)                     # == x.view(B, -1), row-major
    assert x_flat.shape[1] == meta.D and y_soft.shape[1] == meta.C

    cd = weights["w1x"].dtype
    in_itemsize = cd.itemsize
    w_itemsize = cd.itemsize
    D, C = meta.D, meta.C
    Dp, Cp, Hp, Np = meta.Dp, meta.Cp, meta.Hp, meta.Np

    tile_b, Bp, vmem_limit, single_buffer, weight_bytes = _plan(
        B, meta, in_itemsize, w_itemsize, tile_b_max=tile_b_max,
        min_grid_tiles=4, vmem_budget_bytes=vmem_budget_bytes)

    # Constant-index weights: single-buffered residency once they're big
    # enough for double-buffering to waste meaningful VMEM.
    wkw = {"pipeline_mode": pl.Buffered(1)} if single_buffer else {}

    # ---- pad / cast activations (y folded into x's pad columns if possible) ----
    if meta.folded:
        xp = jnp.zeros((Bp, Dp), cd)
        xp = xp.at[:B, :D].set(x_flat.astype(cd))
        xp = xp.at[:B, D:D + C].set(y_soft.astype(cd))
        operands = (xp,)
        kernel = _encoder_kernel_folded
        data_specs = [pl.BlockSpec((tile_b, Dp), lambda i: (i, 0))]
        weight_ops = (weights["w1x"], weights["b1"], weights["w2"],
                      weights["b2"])
        weight_specs = [
            pl.BlockSpec((Dp, Hp), lambda i: (0, 0), **wkw),
            pl.BlockSpec((1, Hp), lambda i: (0, 0), **wkw),
            pl.BlockSpec((Hp, Np), lambda i: (0, 0), **wkw),
            pl.BlockSpec((1, Np), lambda i: (0, 0), **wkw),
        ]
        flops = 2 * Bp * Dp * Hp + 2 * Bp * Hp * Np
        act_bytes = Bp * Dp * in_itemsize
    else:
        if Bp == B and Dp == D:
            xp = x_flat.astype(cd)
        else:
            xp = jnp.zeros((Bp, Dp), cd).at[:B, :D].set(x_flat.astype(cd))
        yp = jnp.zeros((Bp, Cp), cd).at[:B, :C].set(y_soft.astype(cd))
        operands = (xp, yp)
        kernel = _encoder_kernel_split
        data_specs = [pl.BlockSpec((tile_b, Dp), lambda i: (i, 0)),
                      pl.BlockSpec((tile_b, Cp), lambda i: (i, 0))]
        weight_ops = (weights["w1x"], weights["w1y"], weights["b1"],
                      weights["w2"], weights["b2"])
        weight_specs = [
            pl.BlockSpec((Dp, Hp), lambda i: (0, 0), **wkw),
            pl.BlockSpec((Cp, Hp), lambda i: (0, 0), **wkw),
            pl.BlockSpec((1, Hp), lambda i: (0, 0), **wkw),
            pl.BlockSpec((Hp, Np), lambda i: (0, 0), **wkw),
            pl.BlockSpec((1, Np), lambda i: (0, 0), **wkw),
        ]
        flops = 2 * Bp * (Dp + Cp) * Hp + 2 * Bp * Hp * Np
        act_bytes = Bp * (Dp + Cp) * in_itemsize

    bytes_accessed = act_bytes + weight_bytes + Bp * Np * 4

    out_pad = pl.pallas_call(
        kernel,
        out_shape=jax.ShapeDtypeStruct((Bp, Np), jnp.float32),
        grid_spec=pltpu.PrefetchScalarGridSpec(
            num_scalar_prefetch=0,
            grid=(Bp // tile_b,),
            in_specs=data_specs + weight_specs,
            out_specs=pl.BlockSpec((tile_b, Np), lambda i: (i, 0)),
        ),
        compiler_params=pltpu.CompilerParams(
            dimension_semantics=("parallel",),    # batch tiles across v7x's 2 TCs
            vmem_limit_bytes=vmem_limit,
        ),
        cost_estimate=pl.CostEstimate(flops=flops, transcendentals=0,
                                      bytes_accessed=bytes_accessed),
    )(*operands, *weight_ops)

    hs = meta.head_stride
    mu = out_pad[:B, :meta.L]
    logvar = out_pad[:B, hs:hs + meta.L]
    return mu, logvar


# --------------------------------------------------------------------------
# Synthetic params + pure-JAX reference
# --------------------------------------------------------------------------
def init_params(key, input_dim, num_classes, latent_dim, hidden=400):
    """Deterministic synthetic parameter init (nn.Linear shapes, transposed)."""
    ks = jax.random.split(key, 6)
    s1 = 1.0 / jnp.sqrt(input_dim + num_classes)
    s2 = 1.0 / jnp.sqrt(hidden)
    return {
        "w1":  jax.random.uniform(ks[0], (input_dim + num_classes, hidden),
                                  jnp.float32, -s1, s1),
        "b1":  jax.random.uniform(ks[1], (1, hidden), jnp.float32, -s1, s1),
        "wmu": jax.random.uniform(ks[2], (hidden, latent_dim),
                                  jnp.float32, -s2, s2),
        "bmu": jax.random.uniform(ks[3], (1, latent_dim), jnp.float32, -s2, s2),
        "wlv": jax.random.uniform(ks[4], (hidden, latent_dim),
                                  jnp.float32, -s2, s2),
        "blv": jax.random.uniform(ks[5], (1, latent_dim), jnp.float32, -s2, s2),
    }


def reference_forward(x, y_soft, params):
    """Pure-JAX reference mirroring the PyTorch Encoder.forward."""
    B = x.shape[0]
    xc = jnp.concatenate([x.reshape(B, -1), y_soft], axis=1)
    h = jax.nn.relu(xc @ params["w1"] + params["b1"])
    return h @ params["wmu"] + params["bmu"], h @ params["wlv"] + params["blv"]


# --------------------------------------------------------------------------
# Self-test
# --------------------------------------------------------------------------
if __name__ == "__main__":
    def run_case(name, B, C_in, HW, latent_dim, condition_size, key):
        kx, ky, kp = jax.random.split(key, 3)
        input_dim = C_in * HW * HW
        x = jax.random.normal(kx, (B, C_in, HW, HW), jnp.float32)
        y_soft = jax.nn.softmax(
            jax.random.normal(ky, (B, condition_size), jnp.float32), axis=-1)
        params = init_params(kp, input_dim, condition_size, latent_dim)
        mu_ref, lv_ref = reference_forward(x, y_soft, params)

        # f32 path: padding / head fusion / y-fold must be numerically exact.
        w32, m32 = pack_weights(params, input_dim, compute_dtype=jnp.float32)
        mu32, lv32 = jax.block_until_ready(
            res_encoder_forward(x, y_soft, w32, m32))
        assert mu32.shape == (B, latent_dim) and lv32.shape == (B, latent_dim)
        assert jnp.allclose(mu32, mu_ref, atol=1e-4, rtol=1e-4), name
        assert jnp.allclose(lv32, lv_ref, atol=1e-4, rtol=1e-4), name

        # bf16 MXU path: weights packed & cast ONCE, reused across calls.
        wbf, mbf = pack_weights(params, input_dim, compute_dtype=jnp.bfloat16)
        mu, lv = jax.block_until_ready(res_encoder_forward(x, y_soft, wbf, mbf))
        mu2, lv2 = jax.block_until_ready(
            res_encoder_forward(x, y_soft, wbf, mbf))   # warm, cached weights
        assert jnp.allclose(mu, mu_ref, atol=3e-2, rtol=3e-2), name
        assert jnp.allclose(lv, lv_ref, atol=3e-2, rtol=3e-2), name
        assert jnp.allclose(mu, mu2) and jnp.allclose(lv, lv2), name

    key = jax.random.PRNGKey(0)
    k1, k2 = jax.random.split(key)
    # D = 1024 (256-aligned): split-dot path, x never copied just for a concat.
    run_case("aligned", B=2, C_in=4, HW=16, latent_dim=32,
             condition_size=10, key=k1)
    # D = 400 (pad slack >= num_classes): y_soft folded into x's pad columns.
    run_case("folded", B=2, C_in=4, HW=10, latent_dim=32,
             condition_size=10, key=k2)

    print("KERNEL_OK")
</pallas_src>

<mosaic_0001>
module attributes {stable_mosaic.version = 11 : i64} {
  func.func @_encoder_kernel_split(%arg0: i32, %arg1: memref<8x1024xf32, #tpu.memory_space<vmem>>, %arg2: memref<8x128xf32, #tpu.memory_space<vmem>>, %arg3: memref<1024x512xf32, #tpu.memory_space<vmem>>, %arg4: memref<128x512xf32, #tpu.memory_space<vmem>>, %arg5: memref<1x512xf32, #tpu.memory_space<vmem>>, %arg6: memref<512x256xf32, #tpu.memory_space<vmem>>, %arg7: memref<1x256xf32, #tpu.memory_space<vmem>>, %arg8: memref<8x256xf32, #tpu.memory_space<vmem>>) attributes {dimension_semantics = [#tpu.dimension_semantics<parallel>], iteration_bounds = array<i64: 1>, scalar_prefetch = 0 : i64, scratch_operands = 0 : i64, tpu.core_type = #tpu.core_type<tc>, window_params = [{transform_indices = @transform_0, window_bounds = array<i64: 8, 1024>}, {transform_indices = @transform_1, window_bounds = array<i64: 8, 128>}, {pipeline_mode = #tpu.pipeline_mode<synchronous>, transform_indices = @transform_2, window_bounds = array<i64: 1024, 512>}, {pipeline_mode = #tpu.pipeline_mode<synchronous>, transform_indices = @transform_3, window_bounds = array<i64: 128, 512>}, {pipeline_mode = #tpu.pipeline_mode<synchronous>, transform_indices = @transform_4, window_bounds = array<i64: 1, 512>}, {pipeline_mode = #tpu.pipeline_mode<synchronous>, transform_indices = @transform_5, window_bounds = array<i64: 512, 256>}, {pipeline_mode = #tpu.pipeline_mode<synchronous>, transform_indices = @transform_6, window_bounds = array<i64: 1, 256>}, {transform_indices = @transform_7, window_bounds = array<i64: 8, 256>}]} {
    %c0 = arith.constant 0 : index
    %c0_0 = arith.constant 0 : index
    %0 = vector.load %arg1[%c0, %c0_0] : memref<8x1024xf32, #tpu.memory_space<vmem>>, vector<8x1024xf32>
    %c0_1 = arith.constant 0 : index
    %c0_2 = arith.constant 0 : index
    %1 = vector.load %arg3[%c0_1, %c0_2] : memref<1024x512xf32, #tpu.memory_space<vmem>>, vector<1024x512xf32>
    %cst = arith.constant dense<0.000000e+00> : vector<8x512xf32>
    %2 = tpu.matmul %0, %1, %cst {dimension_numbers = #tpu.dot_dimension_numbers<[1], [0], [0], [1], [0, 0, 1, 1], [], []>} : vector<8x1024xf32>, vector<1024x512xf32>, vector<8x512xf32> -> vector<8x512xf32>
    %c0_3 = arith.constant 0 : index
    %c0_4 = arith.constant 0 : index
    %3 = vector.load %arg2[%c0_3, %c0_4] : memref<8x128xf32, #tpu.memory_space<vmem>>, vector<8x128xf32>
    %c0_5 = arith.constant 0 : index
    %c0_6 = arith.constant 0 : index
    %4 = vector.load %arg4[%c0_5, %c0_6] : memref<128x512xf32, #tpu.memory_space<vmem>>, vector<128x512xf32>
    %cst_7 = arith.constant dense<0.000000e+00> : vector<8x512xf32>
    %5 = tpu.matmul %3, %4, %cst_7 {dimension_numbers = #tpu.dot_dimension_numbers<[1], [0], [0], [1], [0, 0, 1, 1], [], []>} : vector<8x128xf32>, vector<128x512xf32>, vector<8x512xf32> -> vector<8x512xf32>
    %6 = arith.addf %2, %5 : vector<8x512xf32>
    %c0_8 = arith.constant 0 : index
    %c0_9 = arith.constant 0 : index
    %7 = vector.load %arg5[%c0_8, %c0_9] : memref<1x512xf32, #tpu.memory_space<vmem>>, vector<1x512xf32>
    %8 = vector.broadcast %7 : vector<1x512xf32> to vector<8x512xf32>
    %9 = arith.addf %6, %8 : vector<8x512xf32>
    %cst_10 = arith.constant 0.000000e+00 : f32
    %10 = vector.broadcast %cst_10 : f32 to vector<8x512xf32>
    %11 = arith.maximumf %9, %10 : vector<8x512xf32>
    %c0_11 = arith.constant 0 : index
    %c0_12 = arith.constant 0 : index
    %12 = vector.load %arg6[%c0_11, %c0_12] : memref<512x256xf32, #tpu.memory_space<vmem>>, vector<512x256xf32>
    %cst_13 = arith.constant dense<0.000000e+00> : vector<8x256xf32>
    %13 = tpu.matmul %11, %12, %cst_13 {dimension_numbers = #tpu.dot_dimension_numbers<[1], [0], [0], [1], [0, 0, 1, 1], [], []>} : vector<8x512xf32>, vector<512x256xf32>, vector<8x256xf32> -> vector<8x256xf32>
    %c0_14 = arith.constant 0 : index
    %c0_15 = arith.constant 0 : index
    %14 = vector.load %arg7[%c0_14, %c0_15] : memref<1x256xf32, #tpu.memory_space<vmem>>, vector<1x256xf32>
    %15 = vector.broadcast %14 : vector<1x256xf32> to vector<8x256xf32>
    %16 = arith.addf %13, %15 : vector<8x256xf32>
    %c0_16 = arith.constant 0 : index
    %c0_17 = arith.constant 0 : index
    %17 = vector.load %arg8[%c0_16, %c0_17] : memref<8x256xf32, #tpu.memory_space<vmem>>, vector<8x256xf32>
    tpu.vector_store %arg8[%c0_16, %c0_17], %16 {strides = array<i32>} : memref<8x256xf32, #tpu.memory_space<vmem>>, vector<8x256xf32>,
    return
  }
  func.func @transform_0(%arg0: i32) -> (i32, i32) {
    %c0_i32 = arith.constant 0 : i32
    %c0_i32_0 = arith.constant 0 : i32
    return %arg0, %c0_i32 : i32, i32
  }
  func.func @transform_1(%arg0: i32) -> (i32, i32) {
    %c0_i32 = arith.constant 0 : i32
    %c0_i32_0 = arith.constant 0 : i32
    return %arg0, %c0_i32 : i32, i32
  }
  func.func @transform_2(%arg0: i32) -> (i32, i32) {
    %c0_i32 = arith.constant 0 : i32
    %c0_i32_0 = arith.constant 0 : i32
    %c0_i32_1 = arith.constant 0 : i32
    return %c0_i32, %c0_i32_0 : i32, i32
  }
  func.func @transform_3(%arg0: i32) -> (i32, i32) {
    %c0_i32 = arith.constant 0 : i32
    %c0_i32_0 = arith.constant 0 : i32
    %c0_i32_1 = arith.constant 0 : i32
    return %c0_i32, %c0_i32_0 : i32, i32
  }
  func.func @transform_4(%arg0: i32) -> (i32, i32) {
    %c0_i32 = arith.constant 0 : i32
    %c0_i32_0 = arith.constant 0 : i32
    %c0_i32_1 = arith.constant 0 : i32
    return %c0_i32, %c0_i32_0 : i32, i32
  }
  func.func @transform_5(%arg0: i32) -> (i32, i32) {
    %c0_i32 = arith.constant 0 : i32
    %c0_i32_0 = arith.constant 0 : i32
    %c0_i32_1 = arith.constant 0 : i32
    return %c0_i32, %c0_i32_0 : i32, i32
  }
  func.func @transform_6(%arg0: i32) -> (i32, i32) {
    %c0_i32 = arith.constant 0 : i32
    %c0_i32_0 = arith.constant 0 : i32
    %c0_i32_1 = arith.constant 0 : i32
    return %c0_i32, %c0_i32_0 : i32, i32
  }
  func.func @transform_7(%arg0: i32) -> (i32, i32) {
    %c0_i32 = arith.constant 0 : i32
    %c0_i32_0 = arith.constant 0 : i32
    return %arg0, %c0_i32 : i32, i32
  }
}

</mosaic_0001>

<bundles_post_ra>
// kernel: res_encoder_forward.1
= control target key start
LH: loop header
LB: loop body
LE: loop exit
PB: predicated region body
PF: predicated region fallthrough
CT: control target
= control target key end

     0   :  { %12 = vsyncpa [#allocation3], 0  ;;  %s2776_s0 = inlined_call_operand.vmem [shape: f32[8,1024], index: 0, kind: input, shape index: {}]   ;;  %s2777_s1 = inlined_call_operand.vmem [shape: f32[8,128], index: 1, kind: input, shape index: {}]   ;;  %s2778_s2 = inlined_call_operand.hbm [shape: f32[1024,512], index: 2, kind: input, shape index: {}]   ;;  %s2779_s3 = inlined_call_operand.hbm [shape: f32[128,512], index: 3, kind: input, shape index: {}]   ;;  %s2780_s4 = inlined_call_operand.hbm [shape: f32[1,512], index: 4, kind: input, shape index: {}]   ;;  %s2781_s5 = inlined_call_operand.hbm [shape: f32[512,256], index: 5, kind: input, shape index: {}]   ;;  %s2782_s6 = inlined_call_operand.hbm [shape: f32[1,256], index: 6, kind: input, shape index: {}]   ;;  %s2783_s7 = inlined_call_operand.vmem [shape: f32[8,256], index: 7, kind: output, shape index: {}]  }
   0x1   :  { %13 = vsyncpa [#allocation5], 0 }
   0x2   :  { %14 = vsyncpa [#allocation8], 0  ;;  %s2557_s24 = smov [#allocation4]   ;;  %s2558_s26 = smov [#allocation7]  }
   0x3   :  { %s36_s25 = sshll.u32 %s2557_s24, 4  ;;  %s58_s27 = sshll.u32 %s2558_s26, 4  ;;  %s37_s25 = int_to_ptr.vmem [resolvable:$true] %s36_s25  ;;  %s2607_s27 = int_to_ptr.vmem [resolvable:$true] %s58_s27 }
   0x4   :  { %s2441_s30 = scalar_lea.hbm %s2779_s3, 8192 }
   0x5   :  { %p2442_p0 = scmp.ne.s32.totalorder %s2779_s3, %s2441_s30  ;;  %p2445_p1 = scmp.lt.u32.totalorder %s2441_s30, %s2779_s3 }
   0x7   :  { %p2447_p2 = pnand %p2445_p1, %p2442_p0 }
   0x9   :  { %2450 = shalt.err (!%p2447_p2)
}
   0xa   :  { %s2451_s12 = scalar_lea.vmem %s37_s25, 8192  ;;  %p2456_p4 = scmp.lt.s32.totalorder %s37_s25, %s37_s25 }
   0xb   :  { %p2452_p3 = scmp.ne.s32.totalorder %s37_s25, %s2451_s12  ;;  %p2457_p5 = scmp.lt.s32.totalorder %s2451_s12, %s2451_s12 }
   0xd   :  { %p2458_p6 = por %p2457_p5, %p2456_p4 }
   0xf   :  { %p2459_p7 = pnand %p2458_p6, %p2452_p3 }
  0x11   :  { %2462 = shalt.err (!%p2459_p7)
}
  0x12   :  { %s2559_s13 = smov 512   ;;  %s2560_s14 = smov 32  }
  0x13   :  { %42 = dma.hbm_to_vmem [thread:$0]  %s2779_s3, 8192, %s37_s25, [#allocation5], %s2559_s13, %s2559_s13, %s2560_s14  }
  0x14   :  { %s2463_s19 = scalar_lea.hbm %s2781_s5, 16384 }
  0x15   :  { %p2464_p8 = scmp.ne.s32.totalorder %s2781_s5, %s2463_s19  ;;  %p2467_p9 = scmp.lt.u32.totalorder %s2463_s19, %s2781_s5 }
  0x17   :  { %p2469_p10 = pnand %p2467_p9, %p2464_p8 }
  0x19   :  { %2472 = shalt.err (!%p2469_p10)
}
  0x1a   :  { %s2473_s24 = scalar_lea.vmem %s2607_s27, 16384  ;;  %p2478_p12 = scmp.lt.s32.totalorder %s2607_s27, %s2607_s27 }
  0x1b   :  { %p2474_p11 = scmp.ne.s32.totalorder %s2607_s27, %s2473_s24  ;;  %p2479_p13 = scmp.lt.s32.totalorder %s2473_s24, %s2473_s24 }
  0x1d   :  { %p2480_p0 = por %p2479_p13, %p2478_p12 }
  0x1f   :  { %p2481_p1 = pnand %p2480_p0, %p2474_p11 }
  0x21   :  { %2484 = shalt.err (!%p2481_p1)
}
  0x22   :  { %s2561_s3 = smov 256   ;;  %s2562_s25 = smov 16  }
  0x23   :  { %64 = dma.hbm_to_vmem [thread:$0]  %s2781_s5, 16384, %s2607_s27, [#allocation8], %s2561_s3, %s2561_s3, %s2562_s25  }
  0x24   :  { %s2563_s29 = smov [#allocation2]   ;;  %s2564_s8 = smov [#allocation6]  }
  0x25   :  { %s24_s30 = sshll.u32 %s2563_s29, 4  ;;  %s49_s9 = sshll.u32 %s2564_s8, 4  ;;  %s25_s30 = int_to_ptr.vmem [resolvable:$true] %s24_s30  ;;  %s50_s9 = int_to_ptr.vmem [resolvable:$true] %s49_s9 }
  0x26   :  { %s2485_s12 = scalar_lea.hbm %s2778_s2, 65536 }
  0x27   :  { %p2486_p2 = scmp.ne.s32.totalorder %s2778_s2, %s2485_s12  ;;  %p2489_p3 = scmp.lt.u32.totalorder %s2485_s12, %s2778_s2 }
  0x29   :  { %p2491_p4 = pnand %p2489_p3, %p2486_p2 }
  0x2b   :  { %2494 = shalt.err (!%p2491_p4)
}
  0x2c   :  { %s2495_s5 = scalar_lea.vmem %s25_s30, 65536  ;;  %p2500_p6 = scmp.lt.s32.totalorder %s25_s30, %s25_s30 }
  0x2d   :  { %p2496_p5 = scmp.ne.s32.totalorder %s25_s30, %s2495_s5  ;;  %p2501_p7 = scmp.lt.s32.totalorder %s2495_s5, %s2495_s5 }
  0x2f   :  { %p2502_p8 = por %p2501_p7, %p2500_p6 }
  0x31   :  { %p2503_p9 = pnand %p2502_p8, %p2496_p5 }
  0x33   :  { %2506 = shalt.err (!%p2503_p9)
}
  0x34   :  { %30 = dma.hbm_to_vmem [thread:$0]  %s2778_s2, 65536, %s25_s30, [#allocation3], %s2559_s13, %s2559_s13, %s2560_s14  }
  0x35   :  { %s2507_s22 = scalar_lea.hbm %s2780_s4, 64 }
  0x36   :  { %p2508_p10 = scmp.ne.s32.totalorder %s2780_s4, %s2507_s22  ;;  %p2511_p11 = scmp.lt.u32.totalorder %s2507_s22, %s2780_s4 }
  0x38   :  { %p2513_p12 = pnand %p2511_p11, %p2508_p10 }
  0x3a   :  { %2516 = shalt.err (!%p2513_p12)
}
  0x3b   :  { %s2517_s26 = scalar_lea.vmem %s50_s9, 64  ;;  %p2522_p0 = scmp.lt.s32.totalorder %s50_s9, %s50_s9 }
  0x3c   :  { %p2518_p13 = scmp.ne.s32.totalorder %s50_s9, %s2517_s26  ;;  %p2523_p1 = scmp.lt.s32.totalorder %s2517_s26, %s2517_s26 }
  0x3e   :  { %p2524_p2 = por %p2523_p1, %p2522_p0 }
  0x40   :  { %p2525_p3 = pnand %p2524_p2, %p2518_p13 }
  0x42   :  { %2528 = shalt.err (!%p2525_p3)
}
  0x43   :  { %52 = dma.hbm_to_vmem [thread:$0]  %s2780_s4, 64, %s50_s9, [#allocation5]  }
  0x44   :  { %s2565_s14 = smov [#allocation9]   ;;  %s2529_s8 = scalar_lea.hbm %s2782_s6, 32 }
  0x45   :  { %s71_s28 = sshll.u32 %s2565_s14, 4  ;;  %p2530_p4 = scmp.ne.s32.totalorder %s2782_s6, %s2529_s8  ;;  %s72_s28 = int_to_ptr.vmem [resolvable:$true] %s71_s28 }
  0x46   :  { %p2533_p5 = scmp.lt.u32.totalorder %s2529_s8, %s2782_s6 }
  0x48   :  { %p2535_p6 = pnand %p2533_p5, %p2530_p4 }
  0x4a   :  { %2538 = shalt.err (!%p2535_p6)
}
  0x4b   :  { %s2539_s16 = scalar_lea.vmem %s72_s28, 32  ;;  %p2544_p8 = scmp.lt.s32.totalorder %s72_s28, %s72_s28 }
  0x4c   :  { %p2540_p7 = scmp.ne.s32.totalorder %s72_s28, %s2539_s16  ;;  %p2545_p9 = scmp.lt.s32.totalorder %s2539_s16, %s2539_s16 }
  0x4e   :  { %p2546_p10 = por %p2545_p9, %p2544_p8 }
  0x50   :  { %p2547_p11 = pnand %p2546_p10, %p2540_p7 }
  0x52   :  { %2550 = shalt.err (!%p2547_p11)
}
  0x53   :  { %74 = dma.hbm_to_vmem [thread:$0]  %s2782_s6, 32, %s72_s28, [#allocation8]  }
  0x54   :  { %2551 = dma.done.wait [#allocation3], 65536  }
  0x55   :  { %2552 = vsyncadd [#allocation3], 4294901760 }
  0x56   :  { %2553 = dma.done.wait [#allocation5], 8256  }
  0x57   :  { %2554 = vsyncadd [#allocation5], 4294959040 }
  0x58   :  { %2555 = dma.done.wait [#allocation8], 16416  }
  0x59   :  { %2556 = vsyncadd [#allocation8], 4294950880  ;;  %v2566_v0 = vmov 0.0   ;;  %v612_v1 = vld [vmem:[#allocation4 + $0x8] sm:$0xff]  ;;  %v614_v3 = vld [vmem:[#allocation4 + $0x18] sm:$0xff] }
  0x5a   :  { %739 = vmatprep.mubr.f32.mxu0 %v2566_v0  ;;  %810 = vmatprep.mubr.f32.mxu1 %v2566_v0  ;;  %v616_v2 = vld [vmem:[#allocation4 + $0x28] sm:$0xff]  ;;  %v618_v5 = vld [vmem:[#allocation4 + $0x38] sm:$0xff]  ;;  %v611_v6 = vld [vmem:[#allocation4] sm:$0xff] }
  0x5b   :  { %v1706_v4 = vpack.c.bf16 %v616_v2, %v612_v1  ;;  %v615_v7 = vld [vmem:[#allocation4 + $0x20] sm:$0xff]  ;;  %v1738_v8 = vpack.c.bf16 %v618_v5, %v614_v3  ;;  %v613_v10 = vld [vmem:[#allocation4 + $0x10] sm:$0xff]  ;;  %v620_v12 = vld [vmem:[#allocation4 + $0x48] sm:$0xff] }
  0x5c   :  { %v1708_v9 = vpack.c.bf16 %v615_v7, %v611_v6  ;;  %v617_v11 = vld [vmem:[#allocation4 + $0x30] sm:$0xff]  ;;  %v624_v14 = vld [vmem:[#allocation4 + $0x68] sm:$0xff]  ;;  %v622_v15 = vld [vmem:[#allocation4 + $0x58] sm:$0xff] }
  0x5d   :  { %1707 = vmatprep.subr.bf16.mxu0 %v1706_v4  ;;  %v1740_v13 = vpack.c.bf16 %v617_v11, %v613_v10  ;;  %v626_v16 = vld [vmem:[#allocation4 + $0x78] sm:$0xff]  ;;  %1739 = vmatprep.subr.bf16.mxu1 %v1738_v8  ;;  %v1710_v17 = vpack.c.bf16 %v624_v14, %v620_v12  ;;  %v619_v19 = vld [vmem:[#allocation4 + $0x40] sm:$0xff]  ;;  %v621_v21 = vld [vmem:[#allocation4 + $0x50] sm:$0xff] }
  0x5e   :  { %1709 = vmatpush1.bf16.msra.mxu0 %v1708_v9  ;;  %v1742_v18 = vpack.c.bf16 %v626_v16, %v622_v15  ;;  %v623_v20 = vld [vmem:[#allocation4 + $0x60] sm:$0xff]  ;;  %v625_v23 = vld [vmem:[#allocation4 + $0x70] sm:$0xff]  ;;  %v628_v24 = vld [vmem:[#allocation4 + $0x88] sm:$0xff] }
  0x5f   :  { %1741 = vmatpush1.bf16.msra.mxu1 %v1740_v13  ;;  %v1712_v22 = vpack.c.bf16 %v623_v20, %v619_v19  ;;  %v632_v25 = vld [vmem:[#allocation4 + $0xa8] sm:$0xff]  ;;  %1711 = vmatprep.subr.bf16.mxu0 %v1710_v17  ;;  %v1744_v26 = vpack.c.bf16 %v625_v23, %v621_v21  ;;  %v630_v28 = vld [vmem:[#allocation4 + $0x98] sm:$0xff]  ;;  %v627_v30 = vld [vmem:[#allocation4 + $0x80] sm:$0xff] }
  0x60   :  { %1743 = vmatprep.subr.bf16.mxu1 %v1742_v18  ;;  %v1714_v27 = vpack.c.bf16 %v632_v25, %v628_v24  ;;  %v634_v29 = vld [vmem:[#allocation4 + $0xb8] sm:$0xff]  ;;  %v631_v32 = vld [vmem:[#allocation4 + $0xa0] sm:$0xff]  ;;  %v629_v33 = vld [vmem:[#allocation4 + $0x90] sm:$0xff] }
  0x61   :  { %v1746_v31 = vpack.c.bf16 %v634_v29, %v630_v28  ;;  %v633_v34 = vld [vmem:[#allocation4 + $0xb0] sm:$0xff]  ;;  %v1716_v35 = vpack.c.bf16 %v631_v32, %v627_v30  ;;  %v636_v36 = vld [vmem:[#allocation4 + $0xc8] sm:$0xff]  ;;  %v638_v38 = vld [vmem:[#allocation4 + $0xd8] sm:$0xff] }
  0x62   :  { %1713 = vmatpush1.bf16.msra.mxu0 %v1712_v22  ;;  %v640_v37 = vld [vmem:[#allocation4 + $0xe8] sm:$0xff]  ;;  %v1748_v39 = vpack.c.bf16 %v633_v34, %v629_v33  ;;  %v642_v41 = vld [vmem:[#allocation4 + $0xf8] sm:$0xff]  ;;  %v635_v42 = vld [vmem:[#allocation4 + $0xc0] sm:$0xff] }
  0x63   :  { %1745 = vmatpush1.bf16.msra.mxu1 %v1744_v26  ;;  %1715 = vmatprep.subr.bf16.mxu0 %v1714_v27  ;;  %v1718_v40 = vpack.c.bf16 %v640_v37, %v636_v36  ;;  %v639_v43 = vld [vmem:[#allocation4 + $0xe0] sm:$0xff]  ;;  %v1750_v44 = vpack.c.bf16 %v642_v41, %v638_v38  ;;  %v637_v45 = vld [vmem:[#allocation4 + $0xd0] sm:$0xff]  ;;  %v644_v47 = vld [vmem:[#allocation4 + $0x108] sm:$0xff] }
  0x64   :  { %1747 = vmatprep.subr.bf16.mxu1 %v1746_v31  ;;  %v641_v46 = vld [vmem:[#allocation4 + $0xf0] sm:$0xff]  ;;  %v648_v48 = vld [vmem:[#allocation4 + $0x128] sm:$0xff]  ;;  %v646_v49 = vld [vmem:[#allocation4 + $0x118] sm:$0xff]  ;;  %v1720_v51 = vpack.c.bf16 %v639_v43, %v635_v42 }
  0x65   :  { %v650_v50 = vld [vmem:[#allocation4 + $0x138] sm:$0xff]  ;;  %v1752_v52 = vpack.c.bf16 %v641_v46, %v637_v45  ;;  %v1722_v53 = vpack.c.bf16 %v648_v48, %v644_v47  ;;  %v643_v54 = vld [vmem:[#allocation4 + $0x100] sm:$0xff]  ;;  %v645_v56 = vld [vmem:[#allocation4 + $0x110] sm:$0xff] }
  0x66   :  { %1717 = vmatpush1.bf16.msra.mxu0 %v1716_v35  ;;  %v647_v55 = vld [vmem:[#allocation4 + $0x120] sm:$0xff]  ;;  %v1754_v57 = vpack.c.bf16 %v650_v50, %v646_v49  ;;  %v649_v58 = vld [vmem:[#allocation4 + $0x130] sm:$0xff]  ;;  %v652_v59 = vld [vmem:[#allocation4 + $0x148] sm:$0xff] }
  0x67   :  { %1749 = vmatpush1.bf16.msra.mxu1 %v1748_v39  ;;  %1719 = vmatprep.subr.bf16.mxu0 %v1718_v40  ;;  %v656_v60 = vld [vmem:[#allocation4 + $0x168] sm:$0xff]  ;;  %v654_v61 = vld [vmem:[#allocation4 + $0x158] sm:$0xff]  ;;  %v1724_v63 = vpack.c.bf16 %v647_v55, %v643_v54  ;;  %v1756_v0 = vpack.c.bf16 %v649_v58, %v645_v56  ;;  %v651_v2 = vld [vmem:[#allocation4 + $0x140] sm:$0xff] }
  0x68   :  { %1751 = vmatprep.subr.bf16.mxu1 %v1750_v44  ;;  %v658_v62 = vld [vmem:[#allocation4 + $0x178] sm:$0xff]  ;;  %v1726_v1 = vpack.c.bf16 %v656_v60, %v652_v59  ;;  %v655_v3 = vld [vmem:[#allocation4 + $0x160] sm:$0xff]  ;;  %v653_v4 = vld [vmem:[#allocation4 + $0x150] sm:$0xff] }
  0x69   :  { %v1758_v5 = vpack.c.bf16 %v658_v62, %v654_v61  ;;  %v657_v6 = vld [vmem:[#allocation4 + $0x170] sm:$0xff]  ;;  %v660_v7 = vld [vmem:[#allocation4 + $0x188] sm:$0xff]  ;;  %v662_v9 = vld [vmem:[#allocation4 + $0x198] sm:$0xff]  ;;  %v1728_v11 = vpack.c.bf16 %v655_v3, %v651_v2 }
  0x6a   :  { %1721 = vmatpush1.bf16.msra.mxu0 %v1720_v51  ;;  %v664_v8 = vld [vmem:[#allocation4 + $0x1a8] sm:$0xff]  ;;  %v666_v10 = vld [vmem:[#allocation4 + $0x1b8] sm:$0xff]  ;;  %v1760_v12 = vpack.c.bf16 %v657_v6, %v653_v4  ;;  %v659_v14 = vld [vmem:[#allocation4 + $0x180] sm:$0xff] }
  0x6b   :  { %1753 = vmatpush1.bf16.msra.mxu1 %v1752_v52  ;;  %1723 = vmatprep.subr.bf16.mxu0 %v1722_v53  ;;  %v1730_v13 = vpack.c.bf16 %v664_v8, %v660_v7  ;;  %v663_v15 = vld [vmem:[#allocation4 + $0x1a0] sm:$0xff]  ;;  %v661_v16 = vld [vmem:[#allocation4 + $0x190] sm:$0xff]  ;;  %v1762_v17 = vpack.c.bf16 %v666_v10, %v662_v9  ;;  %v668_v19 = vld [vmem:[#allocation4 + $0x1c8] sm:$0xff] }
  0x6c   :  { %1755 = vmatprep.subr.bf16.mxu1 %v1754_v57  ;;  %v665_v18 = vld [vmem:[#allocation4 + $0x1b0] sm:$0xff]  ;;  %v672_v20 = vld [vmem:[#allocation4 + $0x1e8] sm:$0xff]  ;;  %v670_v21 = vld [vmem:[#allocation4 + $0x1d8] sm:$0xff]  ;;  %v1732_v23 = vpack.c.bf16 %v663_v15, %v659_v14 }
  0x6d   :  { %v674_v22 = vld [vmem:[#allocation4 + $0x1f8] sm:$0xff]  ;;  %v1764_v24 = vpack.c.bf16 %v665_v18, %v661_v16  ;;  %v1734_v25 = vpack.c.bf16 %v672_v20, %v668_v19  ;;  %v667_v26 = vld [vmem:[#allocation4 + $0x1c0] sm:$0xff]  ;;  %v669_v28 = vld [vmem:[#allocation4 + $0x1d0] sm:$0xff] }
  0x6e   :  { %1725 = vmatpush1.bf16.msra.mxu0 %v1724_v63  ;;  %v671_v27 = vld [vmem:[#allocation4 + $0x1e0] sm:$0xff]  ;;  %v1766_v29 = vpack.c.bf16 %v674_v22, %v670_v21  ;;  %v673_v30 = vld [vmem:[#allocation4 + $0x1f0] sm:$0xff]  ;;  %v227_v31 = vld [vmem:[#allocation2 + $0x408] sm:$0xff] }
  0x6f   :  { %1757 = vmatpush1.bf16.msra.mxu1 %v1756_v0  ;;  %1727 = vmatprep.subr.bf16.mxu0 %v1726_v1  ;;  %v231_v32 = vld [vmem:[#allocation2 + $0x428] sm:$0xff]  ;;  %v1736_v35 = vpack.c.bf16 %v671_v27, %v667_v26  ;;  %v1768_v36 = vpack.c.bf16 %v673_v30, %v669_v28  ;;  %v98_v38 = vld [vmem:[#allocation2] sm:$0xff] }
  0x70   :  { %1759 = vmatprep.subr.bf16.mxu1 %v1758_v5  ;;  %v99_v33 = vld [vmem:[#allocation2 + $0x8] sm:$0xff]  ;;  %v1834_v37 = vpack.c.bf16 %v231_v32, %v227_v31  ;;  %v226_v39 = vld [vmem:[#allocation2 + $0x400] sm:$0xff] }
  0x71   :  { %v103_v34 = vld [vmem:[#allocation2 + $0x28] sm:$0xff]  ;;  %v230_v40 = vld [vmem:[#allocation2 + $0x420] sm:$0xff] }
  0x72   :  { %1729 = vmatpush1.bf16.msra.mxu0 %v1728_v11  ;;  %v1770_v41 = vpack.c.bf16 %v103_v34, %v99_v33  ;;  %v102_v42 = vld [vmem:[#allocation2 + $0x20] sm:$0xff]  ;;  %v235_v43 = vld [vmem:[#allocation2 + $0x448] sm:$0xff]  ;;  %v1836_v48 = vpack.c.bf16 %v230_v40, %v226_v39 }
  0x73   :  { %1761 = vmatpush1.bf16.msra.mxu1 %v1760_v12  ;;  %1731 = vmatprep.subr.bf16.mxu0 %v1730_v13  ;;  %v239_v44 = vld [vmem:[#allocation2 + $0x468] sm:$0xff]  ;;  %v610_v47 = vld [vmem:[%s2777_s1] sm:$0xff]  ;;  %v1772_v49 = vpack.c.bf16 %v102_v42, %v98_v38 }
  0x74   :  { %1763 = vmatprep.subr.bf16.mxu1 %v1762_v17  ;;  %v107_v45 = vld [vmem:[#allocation2 + $0x48] sm:$0xff]  ;;  %v1838_v50 = vpack.c.bf16 %v239_v44, %v235_v43  ;;  %v106_v51 = vld [vmem:[#allocation2 + $0x40] sm:$0xff] }
  0x75   :  { %v111_v46 = vld [vmem:[#allocation2 + $0x68] sm:$0xff]  ;;  %v234_v52 = vld [vmem:[#allocation2 + $0x440] sm:$0xff] }
  0x76   :  { %1733 = vmatpush1.bf16.msra.mxu0 %v1732_v23  ;;  %v238_v53 = vld [vmem:[#allocation2 + $0x460] sm:$0xff]  ;;  %v1774_v54 = vpack.c.bf16 %v111_v46, %v107_v45  ;;  %v243_v56 = vld [vmem:[#allocation2 + $0x488] sm:$0xff] }
  0x77   :  { %1765 = vmatpush1.bf16.msra.mxu1 %v1764_v24  ;;  %1735 = vmatprep.subr.bf16.mxu0 %v1734_v25  ;;  %v110_v55 = vld [vmem:[#allocation2 + $0x60] sm:$0xff]  ;;  %v247_v57 = vld [vmem:[#allocation2 + $0x4a8] sm:$0xff]  ;;  %v1840_v60 = vpack.c.bf16 %v238_v53, %v234_v52 }
  0x78   :  { %1767 = vmatprep.subr.bf16.mxu1 %v1766_v29  ;;  %v115_v58 = vld [vmem:[#allocation2 + $0x88] sm:$0xff]  ;;  %v1776_v61 = vpack.c.bf16 %v110_v55, %v106_v51  ;;  %v1842_v62 = vpack.c.bf16 %v247_v57, %v243_v56  ;;  %v114_v63 = vld [vmem:[#allocation2 + $0x80] sm:$0xff] }
  0x79   :  { %v119_v59 = vld [vmem:[#allocation2 + $0xa8] sm:$0xff]  ;;  %v242_v0 = vld [vmem:[#allocation2 + $0x480] sm:$0xff] }
  0x7a   :  { %1737 = vmatpush1.bf16.msra.mxu0 %v1736_v35  ;;  %v246_v1 = vld [vmem:[#allocation2 + $0x4a0] sm:$0xff]  ;;  %v1778_v2 = vpack.c.bf16 %v119_v59, %v115_v58  ;;  %v251_v4 = vld [vmem:[#allocation2 + $0x4c8] sm:$0xff] }
  0x7b   :  { %1769 = vmatpush1.bf16.msra.mxu1 %v1768_v36  ;;  %1835 = vmatprep.subr.bf16.mxu0 %v1834_v37  ;;  %v118_v3 = vld [vmem:[#allocation2 + $0xa0] sm:$0xff]  ;;  %v255_v5 = vld [vmem:[#allocation2 + $0x4e8] sm:$0xff]  ;;  %v1844_v8 = vpack.c.bf16 %v246_v1, %v242_v0 }
  0x7c   :  { %1771 = vmatprep.subr.bf16.mxu1 %v1770_v41  ;;  %v123_v6 = vld [vmem:[#allocation2 + $0xc8] sm:$0xff]  ;;  %v1780_v9 = vpack.c.bf16 %v118_v3, %v114_v63  ;;  %v1846_v10 = vpack.c.bf16 %v255_v5, %v251_v4  ;;  %v122_v11 = vld [vmem:[#allocation2 + $0xc0] sm:$0xff] }
  0x7d   :  { %740 = vmatmul.mubr.f32.vlgmr.msra.gmra.mrb[0].mxu0 %v610_v47  ;;  %v127_v7 = vld [vmem:[#allocation2 + $0xe8] sm:$0xff]  ;;  %v250_v12 = vld [vmem:[#allocation2 + $0x4c0] sm:$0xff] }
  0x7e   :  { %811 = vmatmul.mubr.f32.vlgmr.msra.gmra.mrb[0].mxu1 %v610_v47  ;;  %1837 = vmatpush1.bf16.msra.mxu0 %v1836_v48  ;;  %v254_v13 = vld [vmem:[#allocation2 + $0x4e0] sm:$0xff]  ;;  %v1782_v14 = vpack.c.bf16 %v127_v7, %v123_v6  ;;  %v259_v16 = vld [vmem:[#allocation2 + $0x508] sm:$0xff] }
  0x7f   :  { %1773 = vmatpush1.bf16.msra.mxu1 %v1772_v49  ;;  %1839 = vmatprep.subr.bf16.mxu0 %v1838_v50  ;;  %v126_v15 = vld [vmem:[#allocation2 + $0xe0] sm:$0xff]  ;;  %v263_v17 = vld [vmem:[#allocation2 + $0x528] sm:$0xff]  ;;  %v1848_v20 = vpack.c.bf16 %v254_v13, %v250_v12 }
  0x80   :  { %1775 = vmatprep.subr.bf16.mxu1 %v1774_v54  ;;  %v131_v18 = vld [vmem:[#allocation2 + $0x108] sm:$0xff]  ;;  %v1784_v21 = vpack.c.bf16 %v126_v15, %v122_v11  ;;  %v1850_v22 = vpack.c.bf16 %v263_v17, %v259_v16  ;;  %v130_v23 = vld [vmem:[#allocation2 + $0x100] sm:$0xff] }
  0x81   :  { %v135_v19 = vld [vmem:[#allocation2 + $0x128] sm:$0xff]  ;;  %v258_v24 = vld [vmem:[#allocation2 + $0x500] sm:$0xff] }
  0x82   :  { %1841 = vmatpush1.bf16.msra.mxu0 %v1840_v60  ;;  %v262_v25 = vld [vmem:[#allocation2 + $0x520] sm:$0xff]  ;;  %v1786_v26 = vpack.c.bf16 %v135_v19, %v131_v18  ;;  %v267_v28 = vld [vmem:[#allocation2 + $0x548] sm:$0xff] }
  0x83   :  { %1777 = vmatpush1.bf16.msra.mxu1 %v1776_v61  ;;  %1843 = vmatprep.subr.bf16.mxu0 %v1842_v62  ;;  %v134_v27 = vld [vmem:[#allocation2 + $0x120] sm:$0xff]  ;;  %v271_v29 = vld [vmem:[#allocation2 + $0x568] sm:$0xff]  ;;  %v1852_v32 = vpack.c.bf16 %v262_v25, %v258_v24 }
  0x84   :  { %1779 = vmatprep.subr.bf16.mxu1 %v1778_v2  ;;  %v139_v30 = vld [vmem:[#allocation2 + $0x148] sm:$0xff]  ;;  %v1788_v33 = vpack.c.bf16 %v134_v27, %v130_v23  ;;  %v1854_v34 = vpack.c.bf16 %v271_v29, %v267_v28  ;;  %v138_v35 = vld [vmem:[#allocation2 + $0x140] sm:$0xff]  ;;  %v2691_v23 = vld [vmem:[%s2776_s0 + $0x18] sm:$0xff] }
  0x85   :  { %v143_v31 = vld [vmem:[#allocation2 + $0x168] sm:$0xff]  ;;  %v266_v36 = vld [vmem:[#allocation2 + $0x540] sm:$0xff]  ;;  %952 = vmatprep.mubr.f32.mxu0 %v2691_v23 }
  0x86   :  { %1845 = vmatpush1.bf16.msra.mxu0 %v1844_v8  ;;  %v270_v37 = vld [vmem:[#allocation2 + $0x560] sm:$0xff]  ;;  %v1790_v38 = vpack.c.bf16 %v143_v31, %v139_v30  ;;  %v275_v40 = vld [vmem:[#allocation2 + $0x588] sm:$0xff] }
  0x87   :  { %1781 = vmatpush1.bf16.msra.mxu1 %v1780_v9  ;;  %1847 = vmatprep.subr.bf16.mxu0 %v1846_v10  ;;  %v142_v39 = vld [vmem:[#allocation2 + $0x160] sm:$0xff]  ;;  %v279_v41 = vld [vmem:[#allocation2 + $0x5a8] sm:$0xff]  ;;  %v1856_v44 = vpack.c.bf16 %v270_v37, %v266_v36 }
  0x88   :  { %1783 = vmatprep.subr.bf16.mxu1 %v1782_v14  ;;  %v147_v42 = vld [vmem:[#allocation2 + $0x188] sm:$0xff]  ;;  %v1792_v45 = vpack.c.bf16 %v142_v39, %v138_v35  ;;  %v1858_v46 = vpack.c.bf16 %v279_v41, %v275_v40  ;;  %v146_v47 = vld [vmem:[#allocation2 + $0x180] sm:$0xff] }
  0x89   :  { %v151_v43 = vld [vmem:[#allocation2 + $0x1a8] sm:$0xff]  ;;  %v274_v48 = vld [vmem:[#allocation2 + $0x580] sm:$0xff] }
  0x8a   :  { %1849 = vmatpush1.bf16.msra.mxu0 %v1848_v20  ;;  %v278_v49 = vld [vmem:[#allocation2 + $0x5a0] sm:$0xff]  ;;  %v1794_v50 = vpack.c.bf16 %v151_v43, %v147_v42  ;;  %v283_v52 = vld [vmem:[#allocation2 + $0x5c8] sm:$0xff] }
  0x8b   :  { %1785 = vmatpush1.bf16.msra.mxu1 %v1784_v21  ;;  %1851 = vmatprep.subr.bf16.mxu0 %v1850_v22  ;;  %v150_v51 = vld [vmem:[#allocation2 + $0x1a0] sm:$0xff]  ;;  %v287_v53 = vld [vmem:[#allocation2 + $0x5e8] sm:$0xff]  ;;  %v1860_v56 = vpack.c.bf16 %v278_v49, %v274_v48 }
  0x8c   :  { %1787 = vmatprep.subr.bf16.mxu1 %v1786_v26  ;;  %v155_v54 = vld [vmem:[#allocation2 + $0x1c8] sm:$0xff]  ;;  %v1796_v57 = vpack.c.bf16 %v150_v51, %v146_v47  ;;  %v1862_v58 = vpack.c.bf16 %v287_v53, %v283_v52  ;;  %v154_v59 = vld [vmem:[#allocation2 + $0x1c0] sm:$0xff] }
  0x8d   :  { %v159_v55 = vld [vmem:[#allocation2 + $0x1e8] sm:$0xff]  ;;  %v282_v60 = vld [vmem:[#allocation2 + $0x5c0] sm:$0xff] }
  0x8e   :  { %1853 = vmatpush1.bf16.msra.mxu0 %v1852_v32  ;;  %v286_v61 = vld [vmem:[#allocation2 + $0x5e0] sm:$0xff]  ;;  %v1798_v62 = vpack.c.bf16 %v159_v55, %v155_v54  ;;  %v291_v0 = vld [vmem:[#allocation2 + $0x608] sm:$0xff] }
  0x8f   :  { %1789 = vmatpush1.bf16.msra.mxu1 %v1788_v33  ;;  %1855 = vmatprep.subr.bf16.mxu0 %v1854_v34  ;;  %v158_v63 = vld [vmem:[#allocation2 + $0x1e0] sm:$0xff]  ;;  %v295_v1 = vld [vmem:[#allocation2 + $0x628] sm:$0xff]  ;;  %v1864_v4 = vpack.c.bf16 %v286_v61, %v282_v60 }
  0x90   :  { %1791 = vmatprep.subr.bf16.mxu1 %v1790_v38  ;;  %v163_v2 = vld [vmem:[#allocation2 + $0x208] sm:$0xff]  ;;  %v1800_v5 = vpack.c.bf16 %v158_v63, %v154_v59  ;;  %v1866_v6 = vpack.c.bf16 %v295_v1, %v291_v0  ;;  %v162_v7 = vld [vmem:[#allocation2 + $0x200] sm:$0xff] }
  0x91   :  { %v167_v3 = vld [vmem:[#allocation2 + $0x228] sm:$0xff]  ;;  %v290_v8 = vld [vmem:[#allocation2 + $0x600] sm:$0xff] }
  0x92   :  { %1857 = vmatpush1.bf16.msra.mxu0 %v1856_v44  ;;  %v294_v9 = vld [vmem:[#allocation2 + $0x620] sm:$0xff]  ;;  %v1802_v10 = vpack.c.bf16 %v167_v3, %v163_v2  ;;  %v299_v12 = vld [vmem:[#allocation2 + $0x648] sm:$0xff] }
  0x93   :  { %1793 = vmatpush1.bf16.msra.mxu1 %v1792_v45  ;;  %1859 = vmatprep.subr.bf16.mxu0 %v1858_v46  ;;  %v166_v11 = vld [vmem:[#allocation2 + $0x220] sm:$0xff]  ;;  %v303_v13 = vld [vmem:[#allocation2 + $0x668] sm:$0xff]  ;;  %v1868_v16 = vpack.c.bf16 %v294_v9, %v290_v8 }
  0x94   :  { %1795 = vmatprep.subr.bf16.mxu1 %v1794_v50  ;;  %v171_v14 = vld [vmem:[#allocation2 + $0x248] sm:$0xff]  ;;  %v170_v17 = vld [vmem:[#allocation2 + $0x240] sm:$0xff]  ;;  %v1804_v19 = vpack.c.bf16 %v166_v11, %v162_v7  ;;  %v1870_v20 = vpack.c.bf16 %v303_v13, %v299_v12 }
  0x95   :  { %v175_v15 = vld [vmem:[#allocation2 + $0x268] sm:$0xff]  ;;  %v298_v21 = vld [vmem:[#allocation2 + $0x640] sm:$0xff] }
  0x96   :  { %1861 = vmatpush1.bf16.msra.mxu0 %v1860_v56  ;;  %v2686_v18 = vld [vmem:[%s2776_s0 + $0x8] sm:$0xff]  ;;  %v302_v22 = vld [vmem:[#allocation2 + $0x660] sm:$0xff]  ;;  %v1806_v24 = vpack.c.bf16 %v175_v15, %v171_v14 }
  0x97   :  { %1797 = vmatpush1.bf16.msra.mxu1 %v1796_v57  ;;  %1863 = vmatprep.subr.bf16.mxu0 %v1862_v58  ;;  %v174_v25 = vld [vmem:[#allocation2 + $0x260] sm:$0xff]  ;;  %v307_v26 = vld [vmem:[#allocation2 + $0x688] sm:$0xff]  ;;  %v1872_v30 = vpack.c.bf16 %v302_v22, %v298_v21 }
  0x98   :  { %1799 = vmatprep.subr.bf16.mxu1 %v1798_v62  ;;  %v311_v27 = vld [vmem:[#allocation2 + $0x6a8] sm:$0xff]  ;;  %881 = vmatprep.mubr.f32.mxu1 %v2686_v18  ;;  %v1808_v31 = vpack.c.bf16 %v174_v25, %v170_v17  ;;  %v178_v33 = vld [vmem:[#allocation2 + $0x280] sm:$0xff] }
  0x99   :  { %v179_v28 = vld [vmem:[#allocation2 + $0x288] sm:$0xff]  ;;  %v1874_v32 = vpack.c.bf16 %v311_v27, %v307_v26  ;;  %v306_v34 = vld [vmem:[#allocation2 + $0x680] sm:$0xff] }
  0x9a   :  { %1865 = vmatpush1.bf16.msra.mxu0 %v1864_v4  ;;  %v183_v29 = vld [vmem:[#allocation2 + $0x2a8] sm:$0xff]  ;;  %v310_v35 = vld [vmem:[#allocation2 + $0x6a0] sm:$0xff] }
  0x9b   :  { %1801 = vmatpush1.bf16.msra.mxu1 %v1800_v5  ;;  %1867 = vmatprep.subr.bf16.mxu0 %v1866_v6  ;;  %v1810_v36 = vpack.c.bf16 %v183_v29, %v179_v28  ;;  %v182_v37 = vld [vmem:[#allocation2 + $0x2a0] sm:$0xff]  ;;  %v315_v38 = vld [vmem:[#allocation2 + $0x6c8] sm:$0xff]  ;;  %v1876_v42 = vpack.c.bf16 %v310_v35, %v306_v34 }
  0x9c   :  { %1803 = vmatprep.subr.bf16.mxu1 %v1802_v10  ;;  %v319_v39 = vld [vmem:[#allocation2 + $0x6e8] sm:$0xff]  ;;  %v1812_v43 = vpack.c.bf16 %v182_v37, %v178_v33  ;;  %v186_v45 = vld [vmem:[#allocation2 + $0x2c0] sm:$0xff] }
  0x9d   :  { %v187_v40 = vld [vmem:[#allocation2 + $0x2c8] sm:$0xff]  ;;  %v1878_v44 = vpack.c.bf16 %v319_v39, %v315_v38  ;;  %v314_v46 = vld [vmem:[#allocation2 + $0x6c0] sm:$0xff]  ;;  %v101_v38 = vld [vmem:[#allocation2 + $0x18] sm:$0xff] }
  0x9e   :  { %1869 = vmatpush1.bf16.msra.mxu0 %v1868_v16  ;;  %v191_v41 = vld [vmem:[#allocation2 + $0x2e8] sm:$0xff]  ;;  %v318_v47 = vld [vmem:[#allocation2 + $0x6e0] sm:$0xff]  ;;  %v105_v39 = vld [vmem:[#allocation2 + $0x38] sm:$0xff] }
  0x9f   :  { %1805 = vmatpush1.bf16.msra.mxu1 %v1804_v19  ;;  %1871 = vmatprep.subr.bf16.mxu0 %v1870_v20  ;;  %v1814_v48 = vpack.c.bf16 %v191_v41, %v187_v40  ;;  %v190_v49 = vld [vmem:[#allocation2 + $0x2e0] sm:$0xff]  ;;  %v323_v50 = vld [vmem:[#allocation2 + $0x708] sm:$0xff]  ;;  %v1880_v54 = vpack.c.bf16 %v318_v47, %v314_v46  ;;  %v2026_v46 = vpack.c.bf16 %v105_v39, %v101_v38  ;;  %v104_v47 = vld [vmem:[#allocation2 + $0x30] sm:$0xff] }
  0xa0   :  { %1807 = vmatprep.subr.bf16.mxu1 %v1806_v24  ;;  %v327_v51 = vld [vmem:[#allocation2 + $0x728] sm:$0xff]  ;;  %v1816_v55 = vpack.c.bf16 %v190_v49, %v186_v45  ;;  %v194_v57 = vld [vmem:[#allocation2 + $0x300] sm:$0xff]  ;;  %v100_v45 = vld [vmem:[#allocation2 + $0x10] sm:$0xff] }
  0xa1   :  { %v195_v52 = vld [vmem:[#allocation2 + $0x308] sm:$0xff]  ;;  %v1882_v56 = vpack.c.bf16 %v327_v51, %v323_v50  ;;  %v322_v58 = vld [vmem:[#allocation2 + $0x700] sm:$0xff]  ;;  %v109_v50 = vld [vmem:[#allocation2 + $0x58] sm:$0xff] }
  0xa2   :  { %1873 = vmatpush1.bf16.msra.mxu0 %v1872_v30  ;;  %v199_v53 = vld [vmem:[#allocation2 + $0x328] sm:$0xff]  ;;  %v326_v59 = vld [vmem:[#allocation2 + $0x720] sm:$0xff]  ;;  %v113_v51 = vld [vmem:[#allocation2 + $0x78] sm:$0xff] }
  0xa3   :  { %1809 = vmatpush1.bf16.msra.mxu1 %v1808_v31  ;;  %1875 = vmatprep.subr.bf16.mxu0 %v1874_v32  ;;  %v1818_v60 = vpack.c.bf16 %v199_v53, %v195_v52  ;;  %v198_v61 = vld [vmem:[#allocation2 + $0x320] sm:$0xff]  ;;  %v331_v62 = vld [vmem:[#allocation2 + $0x748] sm:$0xff]  ;;  %v1884_v2 = vpack.c.bf16 %v326_v59, %v322_v58  ;;  %v92_v53 = vld [vmem:[%s2776_s0 + $0x10] sm:$0xff] }
  0xa4   :  { %1811 = vmatprep.subr.bf16.mxu1 %v1810_v36  ;;  %v335_v63 = vld [vmem:[#allocation2 + $0x768] sm:$0xff]  ;;  %v1820_v3 = vpack.c.bf16 %v198_v61, %v194_v57  ;;  %v202_v5 = vld [vmem:[#allocation2 + $0x340] sm:$0xff]  ;;  %v108_v59 = vld [vmem:[#allocation2 + $0x50] sm:$0xff] }
  0xa5   :  { %v203_v0 = vld [vmem:[#allocation2 + $0x348] sm:$0xff]  ;;  %v1886_v4 = vpack.c.bf16 %v335_v63, %v331_v62  ;;  %v330_v6 = vld [vmem:[#allocation2 + $0x740] sm:$0xff]  ;;  %v112_v61 = vld [vmem:[#allocation2 + $0x70] sm:$0xff] }
  0xa6   :  { %1877 = vmatpush1.bf16.msra.mxu0 %v1876_v42  ;;  %v207_v1 = vld [vmem:[#allocation2 + $0x368] sm:$0xff]  ;;  %v334_v7 = vld [vmem:[#allocation2 + $0x760] sm:$0xff]  ;;  %v141_v38 = vld [vmem:[#allocation2 + $0x158] sm:$0xff] }
  0xa7   :  { %1813 = vmatpush1.bf16.msra.mxu1 %v1812_v43  ;;  %1879 = vmatprep.subr.bf16.mxu0 %v1878_v44  ;;  %v1822_v8 = vpack.c.bf16 %v207_v1, %v203_v0  ;;  %v206_v9 = vld [vmem:[#allocation2 + $0x360] sm:$0xff]  ;;  %v339_v10 = vld [vmem:[#allocation2 + $0x788] sm:$0xff]  ;;  %v1888_v14 = vpack.c.bf16 %v334_v7, %v330_v6  ;;  %v117_v0 = vld [vmem:[#allocation2 + $0x98] sm:$0xff] }
  0xa8   :  { %1815 = vmatprep.subr.bf16.mxu1 %v1814_v48  ;;  %v343_v11 = vld [vmem:[#allocation2 + $0x7a8] sm:$0xff]  ;;  %v1824_v15 = vpack.c.bf16 %v206_v9, %v202_v5  ;;  %v210_v17 = vld [vmem:[#allocation2 + $0x380] sm:$0xff]  ;;  %v121_v1 = vld [vmem:[#allocation2 + $0xb8] sm:$0xff] }
  0xa9   :  { %v211_v12 = vld [vmem:[#allocation2 + $0x388] sm:$0xff]  ;;  %v1890_v16 = vpack.c.bf16 %v343_v11, %v339_v10  ;;  %v338_v19 = vld [vmem:[#allocation2 + $0x780] sm:$0xff]  ;;  %v116_v7 = vld [vmem:[#allocation2 + $0x90] sm:$0xff] }
  0xaa   :  { %1881 = vmatpush1.bf16.msra.mxu0 %v1880_v54  ;;  %v215_v13 = vld [vmem:[#allocation2 + $0x3a8] sm:$0xff]  ;;  %v342_v20 = vld [vmem:[#allocation2 + $0x7a0] sm:$0xff]  ;;  %v120_v9 = vld [vmem:[#allocation2 + $0xb0] sm:$0xff] }
  0xab   :  { %1817 = vmatpush1.bf16.msra.mxu1 %v1816_v55  ;;  %1883 = vmatprep.subr.bf16.mxu0 %v1882_v56  ;;  %v1826_v21 = vpack.c.bf16 %v215_v13, %v211_v12  ;;  %v214_v22 = vld [vmem:[#allocation2 + $0x3a0] sm:$0xff]  ;;  %v347_v24 = vld [vmem:[#allocation2 + $0x7c8] sm:$0xff]  ;;  %v1892_v28 = vpack.c.bf16 %v342_v20, %v338_v19  ;;  %v2028_v55 = vpack.c.bf16 %v104_v47, %v100_v45  ;;  %v125_v12 = vld [vmem:[#allocation2 + $0xd8] sm:$0xff] }
  0xac   :  { %1819 = vmatprep.subr.bf16.mxu1 %v1818_v60  ;;  %v351_v25 = vld [vmem:[#allocation2 + $0x7e8] sm:$0xff]  ;;  %v1828_v29 = vpack.c.bf16 %v214_v22, %v210_v17  ;;  %v218_v31 = vld [vmem:[#allocation2 + $0x3c0] sm:$0xff]  ;;  %v2030_v60 = vpack.c.bf16 %v113_v51, %v109_v50  ;;  %v129_v13 = vld [vmem:[#allocation2 + $0xf8] sm:$0xff] }
  0xad   :  { %v219_v26 = vld [vmem:[#allocation2 + $0x3c8] sm:$0xff]  ;;  %v1894_v30 = vpack.c.bf16 %v351_v25, %v347_v24  ;;  %v346_v32 = vld [vmem:[#allocation2 + $0x7c0] sm:$0xff]  ;;  %v124_v20 = vld [vmem:[#allocation2 + $0xd0] sm:$0xff] }
  0xae   :  { %1885 = vmatpush1.bf16.msra.mxu0 %v1884_v2  ;;  %v223_v27 = vld [vmem:[#allocation2 + $0x3e8] sm:$0xff]  ;;  %v350_v33 = vld [vmem:[#allocation2 + $0x7e0] sm:$0xff]  ;;  %v128_v22 = vld [vmem:[#allocation2 + $0xf0] sm:$0xff] }
  0xaf   :  { %1821 = vmatpush1.bf16.msra.mxu1 %v1820_v3  ;;  %1887 = vmatprep.subr.bf16.mxu0 %v1886_v4  ;;  %v1830_v34 = vpack.c.bf16 %v223_v27, %v219_v26  ;;  %v222_v35 = vld [vmem:[#allocation2 + $0x3e0] sm:$0xff]  ;;  %v355_v36 = vld [vmem:[#allocation2 + $0x808] sm:$0xff]  ;;  %v1896_v40 = vpack.c.bf16 %v350_v33, %v346_v32  ;;  %v2032_v3 = vpack.c.bf16 %v112_v61, %v108_v59  ;;  %v133_v26 = vld [vmem:[#allocation2 + $0x118] sm:$0xff] }
  0xb0   :  { %1823 = vmatprep.subr.bf16.mxu1 %v1822_v8  ;;  %v359_v37 = vld [vmem:[#allocation2 + $0x828] sm:$0xff]  ;;  %v1832_v41 = vpack.c.bf16 %v222_v35, %v218_v31  ;;  %v354_v43 = vld [vmem:[#allocation2 + $0x800] sm:$0xff]  ;;  %v2034_v8 = vpack.c.bf16 %v121_v1, %v117_v0  ;;  %v137_v27 = vld [vmem:[#allocation2 + $0x138] sm:$0xff] }
  0xb1   :  { %v1898_v42 = vpack.c.bf16 %v359_v37, %v355_v36  ;;  %v358_v44 = vld [vmem:[#allocation2 + $0x820] sm:$0xff]  ;;  %v363_v48 = vld [vmem:[#allocation2 + $0x848] sm:$0xff]  ;;  %v132_v33 = vld [vmem:[#allocation2 + $0x110] sm:$0xff] }
  0xb2   :  { %1889 = vmatpush1.bf16.msra.mxu0 %v1888_v14  ;;  %v367_v49 = vld [vmem:[#allocation2 + $0x868] sm:$0xff]  ;;  %v2698_v52 = vld [vmem:[%s2776_s0] sm:$0xff]  ;;  %v1900_v54 = vpack.c.bf16 %v358_v44, %v354_v43  ;;  %v136_v35 = vld [vmem:[#allocation2 + $0x130] sm:$0xff] }
  0xb3   :  { %1825 = vmatpush1.bf16.msra.mxu1 %v1824_v15  ;;  %1891 = vmatprep.subr.bf16.mxu0 %v1890_v16  ;;  %v1902_v56 = vpack.c.bf16 %v367_v49, %v363_v48  ;;  %v362_v57 = vld [vmem:[#allocation2 + $0x840] sm:$0xff]  ;;  %v371_v62 = vld [vmem:[#allocation2 + $0x888] sm:$0xff]  ;;  %v2036_v15 = vpack.c.bf16 %v120_v9, %v116_v7  ;;  %v145_v39 = vld [vmem:[#allocation2 + $0x178] sm:$0xff] }
  0xb4   :  { %1827 = vmatprep.subr.bf16.mxu1 %v1826_v21  ;;  %v366_v58 = vld [vmem:[#allocation2 + $0x860] sm:$0xff]  ;;  %v375_v63 = vld [vmem:[#allocation2 + $0x8a8] sm:$0xff]  ;;  %v2038_v21 = vpack.c.bf16 %v129_v13, %v125_v12  ;;  %v140_v45 = vld [vmem:[#allocation2 + $0x150] sm:$0xff] }
  0xb5   :  { %v1904_v2 = vpack.c.bf16 %v366_v58, %v362_v57  ;;  %v1906_v4 = vpack.c.bf16 %v375_v63, %v371_v62  ;;  %v370_v5 = vld [vmem:[#allocation2 + $0x880] sm:$0xff]  ;;  %v379_v10 = vld [vmem:[#allocation2 + $0x8c8] sm:$0xff]  ;;  %v144_v47 = vld [vmem:[#allocation2 + $0x170] sm:$0xff] }
  0xb6   :  { %1893 = vmatpush1.bf16.msra.mxu0 %v1892_v28  ;;  %v374_v6 = vld [vmem:[#allocation2 + $0x8a0] sm:$0xff]  ;;  %v383_v11 = vld [vmem:[#allocation2 + $0x8e8] sm:$0xff]  ;;  %v149_v50 = vld [vmem:[#allocation2 + $0x198] sm:$0xff] }
  0xb7   :  { %1829 = vmatpush1.bf16.msra.mxu1 %v1828_v29  ;;  %1895 = vmatprep.subr.bf16.mxu0 %v1894_v30  ;;  %v1908_v14 = vpack.c.bf16 %v374_v6, %v370_v5  ;;  %v1910_v16 = vpack.c.bf16 %v383_v11, %v379_v10  ;;  %v378_v17 = vld [vmem:[#allocation2 + $0x8c0] sm:$0xff]  ;;  %v387_v24 = vld [vmem:[#allocation2 + $0x908] sm:$0xff]  ;;  %v2040_v29 = vpack.c.bf16 %v128_v22, %v124_v20  ;;  %v153_v51 = vld [vmem:[#allocation2 + $0x1b8] sm:$0xff] }
  0xb8   :  { %1831 = vmatprep.subr.bf16.mxu1 %v1830_v34  ;;  %v382_v19 = vld [vmem:[#allocation2 + $0x8e0] sm:$0xff]  ;;  %v391_v25 = vld [vmem:[#allocation2 + $0x928] sm:$0xff]  ;;  %v2042_v34 = vpack.c.bf16 %v137_v27, %v133_v26  ;;  %v148_v58 = vld [vmem:[#allocation2 + $0x190] sm:$0xff]  ;;  %v2050_v59 = vpack.c.bf16 %v153_v51, %v149_v50 }
  0xb9   :  { %v2708_v28 = vld [vmem:[%s2776_s0 + $0x28] sm:$0xff]  ;;  %v1914_v30 = vpack.c.bf16 %v391_v25, %v387_v24  ;;  %v386_v31 = vld [vmem:[#allocation2 + $0x900] sm:$0xff]  ;;  %v157_v63 = vld [vmem:[#allocation2 + $0x1d8] sm:$0xff] }
  0xba   :  { %1897 = vmatpush1.bf16.msra.mxu0 %v1896_v40  ;;  %v390_v32 = vld [vmem:[#allocation2 + $0x920] sm:$0xff]  ;;  %v395_v36 = vld [vmem:[#allocation2 + $0x948] sm:$0xff]  ;;  %v161_v0 = vld [vmem:[#allocation2 + $0x1f8] sm:$0xff] }
  0xbb   :  { %1833 = vmatpush1.bf16.msra.mxu1 %v1832_v41  ;;  %1899 = vmatprep.subr.bf16.mxu0 %v1898_v42  ;;  %v399_v37 = vld [vmem:[#allocation2 + $0x968] sm:$0xff]  ;;  %v1916_v40 = vpack.c.bf16 %v390_v32, %v386_v31  ;;  %v2044_v41 = vpack.c.bf16 %v136_v35, %v132_v33  ;;  %v394_v43 = vld [vmem:[#allocation2 + $0x940] sm:$0xff]  ;;  %v156_v6 = vld [vmem:[#allocation2 + $0x1d0] sm:$0xff]  ;;  %v2054_v7 = vpack.c.bf16 %v161_v0, %v157_v63 }
  0xbc   :  { %2027 = vmatprep.subr.bf16.mxu1 %v2026_v46  ;;  %v1918_v42 = vpack.c.bf16 %v399_v37, %v395_v36  ;;  %v398_v44 = vld [vmem:[#allocation2 + $0x960] sm:$0xff]  ;;  %v2046_v46 = vpack.c.bf16 %v145_v39, %v141_v38  ;;  %v403_v48 = vld [vmem:[#allocation2 + $0x988] sm:$0xff]  ;;  %v165_v11 = vld [vmem:[#allocation2 + $0x218] sm:$0xff] }
  0xbd   :  { %953 = vmatmul.mubr.f32.vlgmr.msra.gmra.mrb[2].mxu0 %v92_v53  ;;  %v407_v49 = vld [vmem:[#allocation2 + $0x9a8] sm:$0xff]  ;;  %v1920_v53 = vpack.c.bf16 %v398_v44, %v394_v43  ;;  %v406_v57 = vld [vmem:[#allocation2 + $0x9a0] sm:$0xff]  ;;  %v169_v12 = vld [vmem:[#allocation2 + $0x238] sm:$0xff] }
  0xbe   :  { %882 = vmatmul.mubr.f32.vlgmr.msra.gmra.mrb[2].mxu1 %v2698_v52  ;;  %1901 = vmatpush1.bf16.msra.mxu0 %v1900_v54  ;;  %v2048_v54 = vpack.c.bf16 %v144_v47, %v140_v45  ;;  %v411_v61 = vld [vmem:[#allocation2 + $0x9c8] sm:$0xff]  ;;  %v414_v5 = vld [vmem:[#allocation2 + $0x9e0] sm:$0xff]  ;;  %v2058_v20 = vpack.c.bf16 %v169_v12, %v165_v11  ;;  %v173_v25 = vld [vmem:[#allocation2 + $0x258] sm:$0xff] }
  0xbf   :  { %2029 = vmatpush1.bf16.msra.mxu1 %v2028_v55  ;;  %1903 = vmatprep.subr.bf16.mxu0 %v1902_v56  ;;  %v1922_v55 = vpack.c.bf16 %v407_v49, %v403_v48  ;;  %v402_v56 = vld [vmem:[#allocation2 + $0x980] sm:$0xff]  ;;  %v415_v62 = vld [vmem:[#allocation2 + $0x9e8] sm:$0xff]  ;;  %v177_v26 = vld [vmem:[#allocation2 + $0x278] sm:$0xff] }
  0xc0   :  { %2031 = vmatprep.subr.bf16.mxu1 %v2030_v60  ;;  %1165 = vmatprep.mubr.f32.mxu1 %v2686_v18  ;;  %v1912_v18 = vpack.c.bf16 %v382_v19, %v378_v17  ;;  %v152_v60 = vld [vmem:[#allocation2 + $0x1b0] sm:$0xff]  ;;  %v1924_v1 = vpack.c.bf16 %v406_v57, %v402_v56  ;;  %v419_v9 = vld [vmem:[#allocation2 + $0xa08] sm:$0xff]  ;;  %v422_v17 = vld [vmem:[#allocation2 + $0xa20] sm:$0xff]  ;;  %v2062_v33 = vpack.c.bf16 %v177_v26, %v173_v25 }
  0xc1   :  { %1023 = vmatprep.mubr.f32.mxu0 %v2708_v28  ;;  %v423_v10 = vld [vmem:[#allocation2 + $0xa28] sm:$0xff]  ;;  %v164_v19 = vld [vmem:[#allocation2 + $0x210] sm:$0xff]  ;;  %v430_v31 = vld [vmem:[#allocation2 + $0xa60] sm:$0xff] }
  0xc2   :  { %1905 = vmatpush1.bf16.msra.mxu0 %v1904_v2  ;;  %v2052_v2 = vpack.c.bf16 %v152_v60, %v148_v58  ;;  %v427_v22 = vld [vmem:[#allocation2 + $0xa48] sm:$0xff]  ;;  %v172_v32 = vld [vmem:[#allocation2 + $0x250] sm:$0xff]  ;;  %v181_v37 = vld [vmem:[#allocation2 + $0x298] sm:$0xff] }
  0xc3   :  { %2033 = vmatpush1.bf16.msra.mxu1 %v2032_v3  ;;  %1907 = vmatprep.subr.bf16.mxu0 %v1906_v4  ;;  %v1926_v3 = vpack.c.bf16 %v415_v62, %v411_v61  ;;  %v410_v4 = vld [vmem:[#allocation2 + $0x9c0] sm:$0xff]  ;;  %v431_v24 = vld [vmem:[#allocation2 + $0xa68] sm:$0xff]  ;;  %v185_v38 = vld [vmem:[#allocation2 + $0x2b8] sm:$0xff] }
  0xc4   :  { %2035 = vmatprep.subr.bf16.mxu1 %v2034_v8  ;;  %v160_v8 = vld [vmem:[#allocation2 + $0x1f0] sm:$0xff]  ;;  %v1928_v13 = vpack.c.bf16 %v414_v5, %v410_v4  ;;  %v435_v35 = vld [vmem:[#allocation2 + $0xa88] sm:$0xff]  ;;  %v438_v43 = vld [vmem:[#allocation2 + $0xaa0] sm:$0xff]  ;;  %v2066_v45 = vpack.c.bf16 %v185_v38, %v181_v37 }
  0xc5   :  { %v439_v36 = vld [vmem:[#allocation2 + $0xaa8] sm:$0xff]  ;;  %v180_v44 = vld [vmem:[#allocation2 + $0x290] sm:$0xff]  ;;  %v189_v49 = vld [vmem:[#allocation2 + $0x2d8] sm:$0xff] }
  0xc6   :  { %1909 = vmatpush1.bf16.msra.mxu0 %v1908_v14  ;;  %v2056_v14 = vpack.c.bf16 %v160_v8, %v156_v6  ;;  %v443_v47 = vld [vmem:[#allocation2 + $0xac8] sm:$0xff]  ;;  %v193_v50 = vld [vmem:[#allocation2 + $0x2f8] sm:$0xff]  ;;  %v446_v56 = vld [vmem:[#allocation2 + $0xae0] sm:$0xff] }
  0xc7   :  { %2037 = vmatpush1.bf16.msra.mxu1 %v2036_v15  ;;  %1911 = vmatprep.subr.bf16.mxu0 %v1910_v16  ;;  %v1930_v15 = vpack.c.bf16 %v423_v10, %v419_v9  ;;  %v418_v16 = vld [vmem:[#allocation2 + $0xa00] sm:$0xff]  ;;  %v447_v48 = vld [vmem:[#allocation2 + $0xae8] sm:$0xff]  ;;  %v188_v57 = vld [vmem:[#allocation2 + $0x2d0] sm:$0xff]  ;;  %v2070_v58 = vpack.c.bf16 %v193_v50, %v189_v49 }
  0xc8   :  { %2039 = vmatprep.subr.bf16.mxu1 %v2038_v21  ;;  %v168_v21 = vld [vmem:[#allocation2 + $0x230] sm:$0xff]  ;;  %v1932_v27 = vpack.c.bf16 %v422_v17, %v418_v16  ;;  %v451_v60 = vld [vmem:[#allocation2 + $0xb08] sm:$0xff]  ;;  %v197_v62 = vld [vmem:[#allocation2 + $0x318] sm:$0xff] }
  0xc9   :  { %v455_v61 = vld [vmem:[#allocation2 + $0xb28] sm:$0xff]  ;;  %v201_v63 = vld [vmem:[#allocation2 + $0x338] sm:$0xff]  ;;  %v454_v4 = vld [vmem:[#allocation2 + $0xb20] sm:$0xff] }
  0xca   :  { %1913 = vmatpush1.bf16.msra.mxu0 %v1912_v18  ;;  %v2060_v18 = vpack.c.bf16 %v168_v21, %v164_v19  ;;  %v196_v5 = vld [vmem:[#allocation2 + $0x310] sm:$0xff]  ;;  %v2074_v6 = vpack.c.bf16 %v201_v63, %v197_v62  ;;  %v459_v8 = vld [vmem:[#allocation2 + $0xb48] sm:$0xff]  ;;  %v205_v10 = vld [vmem:[#allocation2 + $0x358] sm:$0xff] }
  0xcb   :  { %2041 = vmatpush1.bf16.msra.mxu1 %v2040_v29  ;;  %1915 = vmatprep.subr.bf16.mxu0 %v1914_v30  ;;  %v1934_v29 = vpack.c.bf16 %v431_v24, %v427_v22  ;;  %v426_v30 = vld [vmem:[#allocation2 + $0xa40] sm:$0xff]  ;;  %v463_v9 = vld [vmem:[#allocation2 + $0xb68] sm:$0xff]  ;;  %v209_v11 = vld [vmem:[#allocation2 + $0x378] sm:$0xff] }
  0xcc   :  { %2043 = vmatprep.subr.bf16.mxu1 %v2042_v34  ;;  %v176_v34 = vld [vmem:[#allocation2 + $0x270] sm:$0xff]  ;;  %v1936_v39 = vpack.c.bf16 %v430_v31, %v426_v30  ;;  %v462_v16 = vld [vmem:[#allocation2 + $0xb60] sm:$0xff]  ;;  %v2078_v19 = vpack.c.bf16 %v209_v11, %v205_v10  ;;  %v467_v21 = vld [vmem:[#allocation2 + $0xb88] sm:$0xff] }
  0xcd   :  { %v204_v17 = vld [vmem:[#allocation2 + $0x350] sm:$0xff]  ;;  %v471_v22 = vld [vmem:[#allocation2 + $0xba8] sm:$0xff]  ;;  %v213_v24 = vld [vmem:[#allocation2 + $0x398] sm:$0xff] }
  0xce   :  { %1917 = vmatpush1.bf16.msra.mxu0 %v1916_v40  ;;  %v2064_v40 = vpack.c.bf16 %v176_v34, %v172_v32  ;;  %v217_v25 = vld [vmem:[#allocation2 + $0x3b8] sm:$0xff]  ;;  %v470_v30 = vld [vmem:[#allocation2 + $0xba0] sm:$0xff]  ;;  %v212_v31 = vld [vmem:[#allocation2 + $0x390] sm:$0xff] }
  0xcf   :  { %2045 = vmatpush1.bf16.msra.mxu1 %v2044_v41  ;;  %1919 = vmatprep.subr.bf16.mxu0 %v1918_v42  ;;  %v1938_v41 = vpack.c.bf16 %v439_v36, %v435_v35  ;;  %v434_v42 = vld [vmem:[#allocation2 + $0xa80] sm:$0xff]  ;;  %v2082_v32 = vpack.c.bf16 %v217_v25, %v213_v24  ;;  %v475_v34 = vld [vmem:[#allocation2 + $0xbc8] sm:$0xff]  ;;  %v221_v36 = vld [vmem:[#allocation2 + $0x3d8] sm:$0xff] }
  0xd0   :  { %2047 = vmatprep.subr.bf16.mxu1 %v2046_v46  ;;  %v184_v46 = vld [vmem:[#allocation2 + $0x2b0] sm:$0xff]  ;;  %v1940_v51 = vpack.c.bf16 %v438_v43, %v434_v42  ;;  %v479_v35 = vld [vmem:[#allocation2 + $0xbe8] sm:$0xff]  ;;  %v225_v37 = vld [vmem:[#allocation2 + $0x3f8] sm:$0xff] }
  0xd1   :  { %v478_v42 = vld [vmem:[#allocation2 + $0xbe0] sm:$0xff]  ;;  %v220_v43 = vld [vmem:[#allocation2 + $0x3d0] sm:$0xff]  ;;  %v233_v49 = vld [vmem:[#allocation2 + $0x438] sm:$0xff] }
  0xd2   :  { %1921 = vmatpush1.bf16.msra.mxu0 %v1920_v53  ;;  %v2068_v53 = vpack.c.bf16 %v184_v46, %v180_v44  ;;  %v2086_v44 = vpack.c.bf16 %v225_v37, %v221_v36  ;;  %v483_v46 = vld [vmem:[#allocation2 + $0xc08] sm:$0xff]  ;;  %v241_v62 = vld [vmem:[#allocation2 + $0x478] sm:$0xff]  ;;  %v2714_v63 = vld [vmem:[%s2776_s0 + $0x20] sm:$0xff] }
  0xd3   :  { %2049 = vmatpush1.bf16.msra.mxu1 %v2048_v54  ;;  %1923 = vmatprep.subr.bf16.mxu0 %v1922_v55  ;;  %v1942_v54 = vpack.c.bf16 %v447_v48, %v443_v47  ;;  %v442_v55 = vld [vmem:[#allocation2 + $0xac0] sm:$0xff]  ;;  %v487_v47 = vld [vmem:[#allocation2 + $0xc28] sm:$0xff]  ;;  %v229_v48 = vld [vmem:[#allocation2 + $0x418] sm:$0xff] }
  0xd4   :  { %2051 = vmatprep.subr.bf16.mxu1 %v2050_v59  ;;  %v192_v59 = vld [vmem:[#allocation2 + $0x2f0] sm:$0xff]  ;;  %v1944_v0 = vpack.c.bf16 %v446_v56, %v442_v55  ;;  %v486_v55 = vld [vmem:[#allocation2 + $0xc20] sm:$0xff]  ;;  %v245_v10 = vld [vmem:[#allocation2 + $0x498] sm:$0xff] }
  0xd5   :  { %v228_v56 = vld [vmem:[#allocation2 + $0x410] sm:$0xff]  ;;  %v249_v11 = vld [vmem:[#allocation2 + $0x4b8] sm:$0xff]  ;;  %v511_v24 = vld [vmem:[#allocation2 + $0xce8] sm:$0xff] }
  0xd6   :  { %1925 = vmatpush1.bf16.msra.mxu0 %v1924_v1  ;;  %v2072_v1 = vpack.c.bf16 %v192_v59, %v188_v57  ;;  %v2090_v57 = vpack.c.bf16 %v233_v49, %v229_v48  ;;  %v491_v59 = vld [vmem:[#allocation2 + $0xc48] sm:$0xff]  ;;  %v253_v25 = vld [vmem:[#allocation2 + $0x4d8] sm:$0xff] }
  0xd7   :  { %2053 = vmatpush1.bf16.msra.mxu1 %v2052_v2  ;;  %1927 = vmatprep.subr.bf16.mxu0 %v1926_v3  ;;  %v1946_v2 = vpack.c.bf16 %v455_v61, %v451_v60  ;;  %v450_v3 = vld [vmem:[#allocation2 + $0xb00] sm:$0xff]  ;;  %v495_v60 = vld [vmem:[#allocation2 + $0xc68] sm:$0xff]  ;;  %v237_v61 = vld [vmem:[#allocation2 + $0x458] sm:$0xff] }
  0xd8   :  { %2055 = vmatprep.subr.bf16.mxu1 %v2054_v7  ;;  %v200_v7 = vld [vmem:[#allocation2 + $0x330] sm:$0xff]  ;;  %v1948_v12 = vpack.c.bf16 %v454_v4, %v450_v3  ;;  %v490_v3 = vld [vmem:[#allocation2 + $0xc40] sm:$0xff]  ;;  %v261_v36 = vld [vmem:[#allocation2 + $0x518] sm:$0xff] }
  0xd9   :  { %v494_v4 = vld [vmem:[#allocation2 + $0xc60] sm:$0xff]  ;;  %v265_v37 = vld [vmem:[#allocation2 + $0x538] sm:$0xff] }
  0xda   :  { %1929 = vmatpush1.bf16.msra.mxu0 %v1928_v13  ;;  %v2076_v13 = vpack.c.bf16 %v200_v7, %v196_v5  ;;  %v236_v5 = vld [vmem:[#allocation2 + $0x450] sm:$0xff]  ;;  %v273_v48 = vld [vmem:[#allocation2 + $0x578] sm:$0xff] }
  0xdb   :  { %2057 = vmatpush1.bf16.msra.mxu1 %v2056_v14  ;;  %1931 = vmatprep.subr.bf16.mxu0 %v1930_v15  ;;  %v1950_v14 = vpack.c.bf16 %v463_v9, %v459_v8  ;;  %v458_v15 = vld [vmem:[#allocation2 + $0xb40] sm:$0xff]  ;;  %v240_v7 = vld [vmem:[#allocation2 + $0x470] sm:$0xff]  ;;  %v499_v8 = vld [vmem:[#allocation2 + $0xc88] sm:$0xff] }
  0xdc   :  { %2059 = vmatprep.subr.bf16.mxu1 %v2058_v20  ;;  %v208_v20 = vld [vmem:[#allocation2 + $0x370] sm:$0xff]  ;;  %v1952_v26 = vpack.c.bf16 %v462_v16, %v458_v15  ;;  %v503_v9 = vld [vmem:[#allocation2 + $0xca8] sm:$0xff]  ;;  %v498_v16 = vld [vmem:[#allocation2 + $0xc80] sm:$0xff] }
  0xdd   :  { %v1970_v15 = vpack.c.bf16 %v503_v9, %v499_v8  ;;  %v543_v8 = vld [vmem:[#allocation2 + $0xde8] sm:$0xff]  ;;  %v285_v9 = vld [vmem:[#allocation2 + $0x5d8] sm:$0xff] }
  0xde   :  { %1933 = vmatpush1.bf16.msra.mxu0 %v1932_v27  ;;  %v2080_v27 = vpack.c.bf16 %v208_v20, %v204_v17  ;;  %v502_v17 = vld [vmem:[#allocation2 + $0xca0] sm:$0xff]  ;;  %v2098_v20 = vpack.c.bf16 %v249_v11, %v245_v10  ;;  %v289_v10 = vld [vmem:[#allocation2 + $0x5f8] sm:$0xff] }
  0xdf   :  { %2061 = vmatpush1.bf16.msra.mxu1 %v2060_v18  ;;  %1935 = vmatprep.subr.bf16.mxu0 %v1934_v29  ;;  %v1954_v18 = vpack.c.bf16 %v471_v22, %v467_v21  ;;  %v466_v29 = vld [vmem:[#allocation2 + $0xb80] sm:$0xff]  ;;  %v248_v21 = vld [vmem:[#allocation2 + $0x4b0] sm:$0xff]  ;;  %v507_v22 = vld [vmem:[#allocation2 + $0xcc8] sm:$0xff] }
  0xe0   :  { %2063 = vmatprep.subr.bf16.mxu1 %v2062_v33  ;;  %v216_v33 = vld [vmem:[#allocation2 + $0x3b0] sm:$0xff]  ;;  %v1956_v38 = vpack.c.bf16 %v470_v30, %v466_v29  ;;  %v506_v29 = vld [vmem:[#allocation2 + $0xcc0] sm:$0xff] }
  0xe1   :  { %v510_v30 = vld [vmem:[#allocation2 + $0xce0] sm:$0xff] }
  0xe2   :  { %1937 = vmatpush1.bf16.msra.mxu0 %v1936_v39  ;;  %v2084_v39 = vpack.c.bf16 %v216_v33, %v212_v31  ;;  %v252_v31 = vld [vmem:[#allocation2 + $0x4d0] sm:$0xff] }
  0xe3   :  { %2065 = vmatpush1.bf16.msra.mxu1 %v2064_v40  ;;  %1939 = vmatprep.subr.bf16.mxu0 %v1938_v41  ;;  %v1958_v40 = vpack.c.bf16 %v479_v35, %v475_v34  ;;  %v474_v41 = vld [vmem:[#allocation2 + $0xbc0] sm:$0xff]  ;;  %v256_v33 = vld [vmem:[#allocation2 + $0x4f0] sm:$0xff]  ;;  %v515_v34 = vld [vmem:[#allocation2 + $0xd08] sm:$0xff] }
  0xe4   :  { %2067 = vmatprep.subr.bf16.mxu1 %v2066_v45  ;;  %v224_v45 = vld [vmem:[#allocation2 + $0x3f0] sm:$0xff]  ;;  %v1960_v50 = vpack.c.bf16 %v478_v42, %v474_v41  ;;  %v519_v35 = vld [vmem:[#allocation2 + $0xd28] sm:$0xff]  ;;  %v518_v41 = vld [vmem:[#allocation2 + $0xd20] sm:$0xff] }
  0xe5   :  { %v260_v42 = vld [vmem:[#allocation2 + $0x510] sm:$0xff] }
  0xe6   :  { %1941 = vmatpush1.bf16.msra.mxu0 %v1940_v51  ;;  %v2088_v51 = vpack.c.bf16 %v224_v45, %v220_v43  ;;  %v2106_v43 = vpack.c.bf16 %v265_v37, %v261_v36  ;;  %v523_v45 = vld [vmem:[#allocation2 + $0xd48] sm:$0xff]  ;;  %v305_v36 = vld [vmem:[#allocation2 + $0x678] sm:$0xff] }
  0xe7   :  { %2069 = vmatpush1.bf16.msra.mxu1 %v2068_v53  ;;  %1943 = vmatprep.subr.bf16.mxu0 %v1942_v54  ;;  %v1962_v53 = vpack.c.bf16 %v487_v47, %v483_v46  ;;  %v482_v54 = vld [vmem:[#allocation2 + $0xc00] sm:$0xff]  ;;  %v527_v46 = vld [vmem:[#allocation2 + $0xd68] sm:$0xff]  ;;  %v269_v47 = vld [vmem:[#allocation2 + $0x558] sm:$0xff] }
  0xe8   :  { %2071 = vmatprep.subr.bf16.mxu1 %v2070_v58  ;;  %v232_v58 = vld [vmem:[#allocation2 + $0x430] sm:$0xff] }
  0xea   :  { %1945 = vmatpush1.bf16.msra.mxu0 %v1944_v0  ;;  %v1964_v0 = vpack.c.bf16 %v486_v55, %v482_v54  ;;  %v526_v54 = vld [vmem:[#allocation2 + $0xd60] sm:$0xff]  ;;  %v268_v55 = vld [vmem:[#allocation2 + $0x550] sm:$0xff] }
  0xeb   :  { %2073 = vmatpush1.bf16.msra.mxu1 %v2072_v1  ;;  %1947 = vmatprep.subr.bf16.mxu0 %v1946_v2  ;;  %v2092_v1 = vpack.c.bf16 %v232_v58, %v228_v56  ;;  %v1966_v2 = vpack.c.bf16 %v495_v60, %v491_v59  ;;  %v2110_v56 = vpack.c.bf16 %v273_v48, %v269_v47  ;;  %v531_v58 = vld [vmem:[#allocation2 + $0xd88] sm:$0xff]  ;;  %v277_v60 = vld [vmem:[#allocation2 + $0x598] sm:$0xff] }
  0xec   :  { %2075 = vmatprep.subr.bf16.mxu1 %v2074_v6  ;;  %v2094_v6 = vpack.c.bf16 %v241_v62, %v237_v61  ;;  %v535_v59 = vld [vmem:[#allocation2 + $0xda8] sm:$0xff]  ;;  %v281_v61 = vld [vmem:[#allocation2 + $0x5b8] sm:$0xff] }
  0xed   :  { %v313_v47 = vld [vmem:[#allocation2 + $0x6b8] sm:$0xff] }
  0xee   :  { %1949 = vmatpush1.bf16.msra.mxu0 %v1948_v12  ;;  %v2720_v12 = vld [vmem:[%s2776_s0 + $0x38] sm:$0xff] }
  0xef   :  { %2077 = vmatpush1.bf16.msra.mxu1 %v2076_v13  ;;  %1951 = vmatprep.subr.bf16.mxu0 %v1950_v14  ;;  %v1968_v13 = vpack.c.bf16 %v494_v4, %v490_v3  ;;  %v2096_v14 = vpack.c.bf16 %v240_v7, %v236_v5  ;;  %v534_v3 = vld [vmem:[#allocation2 + $0xda0] sm:$0xff]  ;;  %v276_v4 = vld [vmem:[#allocation2 + $0x590] sm:$0xff]  ;;  %v2114_v5 = vpack.c.bf16 %v281_v61, %v277_v60  ;;  %v539_v7 = vld [vmem:[#allocation2 + $0xdc8] sm:$0xff] }
  0xf0   :  { %2079 = vmatprep.subr.bf16.mxu1 %v2078_v19  ;;  %v244_v19 = vld [vmem:[#allocation2 + $0x490] sm:$0xff]  ;;  %v321_v60 = vld [vmem:[#allocation2 + $0x6f8] sm:$0xff] }
  0xf2   :  { %1953 = vmatpush1.bf16.msra.mxu0 %v1952_v26  ;;  %v257_v26 = vld [vmem:[#allocation2 + $0x4f8] sm:$0xff] }
  0xf3   :  { %2081 = vmatpush1.bf16.msra.mxu1 %v2080_v27  ;;  %1955 = vmatprep.subr.bf16.mxu0 %v1954_v18  ;;  %v2100_v27 = vpack.c.bf16 %v248_v21, %v244_v19  ;;  %v1974_v18 = vpack.c.bf16 %v511_v24, %v507_v22  ;;  %v2118_v19 = vpack.c.bf16 %v289_v10, %v285_v9  ;;  %v547_v21 = vld [vmem:[#allocation2 + $0xe08] sm:$0xff]  ;;  %v293_v24 = vld [vmem:[#allocation2 + $0x618] sm:$0xff] }
  0xf4   :  { %2083 = vmatprep.subr.bf16.mxu1 %v2082_v32  ;;  %v2102_v32 = vpack.c.bf16 %v257_v26, %v253_v25  ;;  %v551_v22 = vld [vmem:[#allocation2 + $0xe28] sm:$0xff]  ;;  %v297_v25 = vld [vmem:[#allocation2 + $0x638] sm:$0xff] }
  0xf5   :  { %v329_v9 = vld [vmem:[#allocation2 + $0x738] sm:$0xff] }
  0xf6   :  { %1957 = vmatpush1.bf16.msra.mxu0 %v1956_v38  ;;  %v1976_v38 = vpack.c.bf16 %v510_v30, %v506_v29  ;;  %v550_v29 = vld [vmem:[#allocation2 + $0xe20] sm:$0xff]  ;;  %v292_v30 = vld [vmem:[#allocation2 + $0x610] sm:$0xff] }
  0xf7   :  { %2085 = vmatpush1.bf16.msra.mxu1 %v2084_v39  ;;  %1959 = vmatprep.subr.bf16.mxu0 %v1958_v40  ;;  %v1978_v39 = vpack.c.bf16 %v519_v35, %v515_v34  ;;  %v514_v40 = vld [vmem:[#allocation2 + $0xd00] sm:$0xff]  ;;  %v559_v34 = vld [vmem:[#allocation2 + $0xe68] sm:$0xff]  ;;  %v301_v35 = vld [vmem:[#allocation2 + $0x658] sm:$0xff] }
  0xf8   :  { %2087 = vmatprep.subr.bf16.mxu1 %v2086_v44  ;;  %v264_v44 = vld [vmem:[#allocation2 + $0x530] sm:$0xff]  ;;  %v1980_v49 = vpack.c.bf16 %v518_v41, %v514_v40  ;;  %v558_v40 = vld [vmem:[#allocation2 + $0xe60] sm:$0xff] }
  0xf9   :  { %v300_v41 = vld [vmem:[#allocation2 + $0x650] sm:$0xff] }
  0xfa   :  { %1961 = vmatpush1.bf16.msra.mxu0 %v1960_v50  ;;  %v2108_v50 = vpack.c.bf16 %v264_v44, %v260_v42  ;;  %v2126_v42 = vpack.c.bf16 %v305_v36, %v301_v35  ;;  %v563_v44 = vld [vmem:[#allocation2 + $0xe88] sm:$0xff]  ;;  %v345_v35 = vld [vmem:[#allocation2 + $0x7b8] sm:$0xff] }
  0xfb   :  { %2089 = vmatpush1.bf16.msra.mxu1 %v2088_v51  ;;  %1963 = vmatprep.subr.bf16.mxu0 %v1962_v53  ;;  %v1982_v51 = vpack.c.bf16 %v527_v46, %v523_v45  ;;  %v522_v53 = vld [vmem:[#allocation2 + $0xd40] sm:$0xff]  ;;  %v567_v45 = vld [vmem:[#allocation2 + $0xea8] sm:$0xff]  ;;  %v309_v46 = vld [vmem:[#allocation2 + $0x698] sm:$0xff] }
  0xfc   :  { %2091 = vmatprep.subr.bf16.mxu1 %v2090_v57  ;;  %v272_v57 = vld [vmem:[#allocation2 + $0x570] sm:$0xff]  ;;  %v1984_v62 = vpack.c.bf16 %v526_v54, %v522_v53  ;;  %v566_v53 = vld [vmem:[#allocation2 + $0xea0] sm:$0xff] }
  0xfd   :  { %1024 = vmatmul.mubr.f32.vlgmr.msra.gmra.mrb[2].mxu0 %v2714_v63  ;;  %v308_v54 = vld [vmem:[#allocation2 + $0x690] sm:$0xff] }
  0xfe   :  { %1965 = vmatpush1.bf16.msra.mxu0 %v1964_v0  ;;  %1166 = vmatmul.mubr.f32.vlgmr.msra.gmra.mrb[0].mxu1 %v2698_v52  ;;  %v1972_v52 = vpack.c.bf16 %v502_v17, %v498_v16  ;;  %v2112_v0 = vpack.c.bf16 %v272_v57, %v268_v55  ;;  %v542_v16 = vld [vmem:[#allocation2 + $0xde0] sm:$0xff]  ;;  %v284_v17 = vld [vmem:[#allocation2 + $0x5d0] sm:$0xff]  ;;  %v2130_v55 = vpack.c.bf16 %v313_v47, %v309_v46  ;;  %v571_v57 = vld [vmem:[#allocation2 + $0xec8] sm:$0xff] }
  0xff   :  { %2093 = vmatpush1.bf16.msra.mxu1 %v2092_v1  ;;  %1967 = vmatprep.subr.bf16.mxu0 %v1966_v2  ;;  %v1986_v1 = vpack.c.bf16 %v535_v59, %v531_v58  ;;  %v530_v2 = vld [vmem:[#allocation2 + $0xd80] sm:$0xff]  ;;  %v575_v58 = vld [vmem:[#allocation2 + $0xee8] sm:$0xff]  ;;  %v317_v59 = vld [vmem:[#allocation2 + $0x6d8] sm:$0xff] }
 0x100   :  { %2095 = vmatprep.subr.bf16.mxu1 %v2094_v6  ;;  %1094 = vmatprep.mubr.f32.mxu0 %v2720_v12  ;;  %v280_v6 = vld [vmem:[#allocation2 + $0x5b0] sm:$0xff]  ;;  %v1988_v11 = vpack.c.bf16 %v534_v3, %v530_v2  ;;  %v574_v2 = vld [vmem:[#allocation2 + $0xee0] sm:$0xff]  ;;  %v353_v46 = vld [vmem:[#allocation2 + $0x7f8] sm:$0xff] }
 0x101   :  { %1236 = vmatprep.mubr.f32.mxu1 %v2691_v23  ;;  %v2104_v23 = vpack.c.bf16 %v256_v33, %v252_v31  ;;  %v2122_v31 = vpack.c.bf16 %v297_v25, %v293_v24  ;;  %v555_v33 = vld [vmem:[#allocation2 + $0xe48] sm:$0xff]  ;;  %v316_v3 = vld [vmem:[#allocation2 + $0x6d0] sm:$0xff]  ;;  %v337_v24 = vld [vmem:[#allocation2 + $0x778] sm:$0xff] }
 0x102   :  { %1969 = vmatpush1.bf16.msra.mxu0 %v1968_v13  ;;  %v2116_v13 = vpack.c.bf16 %v280_v6, %v276_v4  ;;  %v2134_v4 = vpack.c.bf16 %v321_v60, %v317_v59  ;;  %v579_v6 = vld [vmem:[#allocation2 + $0xf08] sm:$0xff] }
 0x103   :  { %2097 = vmatpush1.bf16.msra.mxu1 %v2096_v14  ;;  %1971 = vmatprep.subr.bf16.mxu0 %v1970_v15  ;;  %v1990_v14 = vpack.c.bf16 %v543_v8, %v539_v7  ;;  %v538_v15 = vld [vmem:[#allocation2 + $0xdc0] sm:$0xff]  ;;  %v583_v7 = vld [vmem:[#allocation2 + $0xf28] sm:$0xff]  ;;  %v325_v8 = vld [vmem:[#allocation2 + $0x718] sm:$0xff] }
 0x104   :  { %2099 = vmatprep.subr.bf16.mxu1 %v2098_v20  ;;  %v288_v20 = vld [vmem:[#allocation2 + $0x5f0] sm:$0xff]  ;;  %v1992_v26 = vpack.c.bf16 %v542_v16, %v538_v15  ;;  %v582_v15 = vld [vmem:[#allocation2 + $0xf20] sm:$0xff] }
 0x105   :  { %v324_v16 = vld [vmem:[#allocation2 + $0x710] sm:$0xff] }
 0x106   :  { %1973 = vmatpush1.bf16.msra.mxu0 %v1972_v52  ;;  %v2120_v52 = vpack.c.bf16 %v288_v20, %v284_v17  ;;  %v2138_v17 = vpack.c.bf16 %v329_v9, %v325_v8  ;;  %v587_v20 = vld [vmem:[#allocation2 + $0xf48] sm:$0xff]  ;;  %v377_v8 = vld [vmem:[#allocation2 + $0x8b8] sm:$0xff]  ;;  %v2440_v9 = vld [vmem:[%s2776_s0 + $0x10] sm:$0xff] }
 0x107   :  { %2101 = vmatpush1.bf16.msra.mxu1 %v2100_v27  ;;  %1975 = vmatprep.subr.bf16.mxu0 %v1974_v18  ;;  %v1994_v27 = vpack.c.bf16 %v551_v22, %v547_v21  ;;  %v546_v18 = vld [vmem:[#allocation2 + $0xe00] sm:$0xff]  ;;  %v591_v21 = vld [vmem:[#allocation2 + $0xf68] sm:$0xff]  ;;  %v333_v22 = vld [vmem:[#allocation2 + $0x758] sm:$0xff] }
 0x108   :  { %2103 = vmatprep.subr.bf16.mxu1 %v2102_v32  ;;  %v296_v32 = vld [vmem:[#allocation2 + $0x630] sm:$0xff]  ;;  %v1996_v37 = vpack.c.bf16 %v550_v29, %v546_v18  ;;  %v590_v18 = vld [vmem:[#allocation2 + $0xf60] sm:$0xff] }
 0x109   :  { %v332_v29 = vld [vmem:[#allocation2 + $0x750] sm:$0xff] }
 0x10a   :  { %1977 = vmatpush1.bf16.msra.mxu0 %v1976_v38  ;;  %v2124_v38 = vpack.c.bf16 %v296_v32, %v292_v30  ;;  %v2142_v30 = vpack.c.bf16 %v337_v24, %v333_v22  ;;  %v595_v32 = vld [vmem:[#allocation2 + $0xf88] sm:$0xff] }
 0x10b   :  { %2105 = vmatpush1.bf16.msra.mxu1 %v2104_v23  ;;  %1979 = vmatprep.subr.bf16.mxu0 %v1978_v39  ;;  %v1998_v23 = vpack.c.bf16 %v559_v34, %v555_v33  ;;  %v554_v39 = vld [vmem:[#allocation2 + $0xe40] sm:$0xff]  ;;  %v599_v33 = vld [vmem:[#allocation2 + $0xfa8] sm:$0xff]  ;;  %v341_v34 = vld [vmem:[#allocation2 + $0x798] sm:$0xff] }
 0x10c   :  { %2107 = vmatprep.subr.bf16.mxu1 %v2106_v43  ;;  %v304_v43 = vld [vmem:[#allocation2 + $0x670] sm:$0xff]  ;;  %v2000_v48 = vpack.c.bf16 %v558_v40, %v554_v39  ;;  %v598_v39 = vld [vmem:[#allocation2 + $0xfa0] sm:$0xff] }
 0x10d   :  { %v340_v40 = vld [vmem:[#allocation2 + $0x790] sm:$0xff] }
 0x10e   :  { %1981 = vmatpush1.bf16.msra.mxu0 %v1980_v49  ;;  %v2128_v49 = vpack.c.bf16 %v304_v43, %v300_v41  ;;  %v2146_v41 = vpack.c.bf16 %v345_v35, %v341_v34  ;;  %v603_v43 = vld [vmem:[#allocation2 + $0xfc8] sm:$0xff]  ;;  %v1425_v35 = vld [vmem:[#allocation7 + $0x50] sm:$0xff] }
 0x10f   :  { %2109 = vmatpush1.bf16.msra.mxu1 %v2108_v50  ;;  %1983 = vmatprep.subr.bf16.mxu0 %v1982_v51  ;;  %v2002_v50 = vpack.c.bf16 %v567_v45, %v563_v44  ;;  %v562_v51 = vld [vmem:[#allocation2 + $0xe80] sm:$0xff]  ;;  %v607_v44 = vld [vmem:[#allocation2 + $0xfe8] sm:$0xff]  ;;  %v349_v45 = vld [vmem:[#allocation2 + $0x7d8] sm:$0xff] }
 0x110   :  { %2111 = vmatprep.subr.bf16.mxu1 %v2110_v56  ;;  %v312_v56 = vld [vmem:[#allocation2 + $0x6b0] sm:$0xff]  ;;  %v2004_v61 = vpack.c.bf16 %v566_v53, %v562_v51  ;;  %v606_v51 = vld [vmem:[#allocation2 + $0xfe0] sm:$0xff]  ;;  %v2150_v53 = vpack.c.bf16 %v353_v46, %v349_v45 }
 0x111   :  { %v1423_v34 = vld [vmem:[#allocation7 + $0x40] sm:$0xff]  ;;  %v1429_v46 = vld [vmem:[#allocation7 + $0x70] sm:$0xff] }
 0x112   :  { %1985 = vmatpush1.bf16.msra.mxu0 %v1984_v62  ;;  %v2132_v62 = vpack.c.bf16 %v312_v56, %v308_v54  ;;  %v348_v54 = vld [vmem:[#allocation2 + $0x7d0] sm:$0xff]  ;;  %v357_v56 = vld [vmem:[#allocation2 + $0x818] sm:$0xff]  ;;  %v1427_v45 = vld [vmem:[#allocation7 + $0x60] sm:$0xff] }
 0x113   :  { %2113 = vmatpush1.bf16.msra.mxu1 %v2112_v0  ;;  %1987 = vmatprep.subr.bf16.mxu0 %v1986_v1  ;;  %v2006_v0 = vpack.c.bf16 %v575_v58, %v571_v57  ;;  %v570_v1 = vld [vmem:[#allocation2 + $0xec0] sm:$0xff]  ;;  %v361_v57 = vld [vmem:[#allocation2 + $0x838] sm:$0xff] }
 0x114   :  { %2115 = vmatprep.subr.bf16.mxu1 %v2114_v5  ;;  %v320_v5 = vld [vmem:[#allocation2 + $0x6f0] sm:$0xff]  ;;  %v2008_v10 = vpack.c.bf16 %v574_v2, %v570_v1  ;;  %v2154_v60 = vpack.c.bf16 %v361_v57, %v357_v56  ;;  %v369_v1 = vld [vmem:[#allocation2 + $0x878] sm:$0xff] }
 0x115   :  { %v2728_v2 = vld [vmem:[%s2776_s0 + $0x30] sm:$0xff] }
 0x116   :  { %1989 = vmatpush1.bf16.msra.mxu0 %v1988_v11  ;;  %v2136_v11 = vpack.c.bf16 %v320_v5, %v316_v3  ;;  %v364_v5 = vld [vmem:[#allocation2 + $0x850] sm:$0xff] }
 0x117   :  { %2117 = vmatpush1.bf16.msra.mxu1 %v2116_v13  ;;  %1991 = vmatprep.subr.bf16.mxu0 %v1990_v14  ;;  %v2010_v13 = vpack.c.bf16 %v583_v7, %v579_v6  ;;  %v578_v14 = vld [vmem:[#allocation2 + $0xf00] sm:$0xff]  ;;  %v368_v6 = vld [vmem:[#allocation2 + $0x870] sm:$0xff]  ;;  %v373_v7 = vld [vmem:[#allocation2 + $0x898] sm:$0xff] }
 0x118   :  { %2119 = vmatprep.subr.bf16.mxu1 %v2118_v19  ;;  %v328_v19 = vld [vmem:[#allocation2 + $0x730] sm:$0xff]  ;;  %v2012_v25 = vpack.c.bf16 %v582_v15, %v578_v14  ;;  %v1418_v14 = vld [vmem:[#allocation7 + $0x18] sm:$0xff]  ;;  %v1415_v15 = vld [vmem:[#allocation7] sm:$0xff]  ;;  %v2162_v22 = vpack.c.bf16 %v377_v8, %v373_v7 }
 0x119   :  { %v396_v56 = vld [vmem:[#allocation2 + $0x950] sm:$0xff]  ;;  %v1435_v8 = vld [vmem:[#allocation7 + $0xa0] sm:$0xff] }
 0x11a   :  { %1993 = vmatpush1.bf16.msra.mxu0 %v1992_v26  ;;  %v2140_v26 = vpack.c.bf16 %v328_v19, %v324_v16  ;;  %v2160_v16 = vpack.c.bf16 %v368_v6, %v364_v5  ;;  %v1417_v19 = vld [vmem:[#allocation7 + $0x10] sm:$0xff] }
 0x11b   :  { %2121 = vmatpush1.bf16.msra.mxu1 %v2120_v52  ;;  %1995 = vmatprep.subr.bf16.mxu0 %v1994_v27  ;;  %v2014_v52 = vpack.c.bf16 %v591_v21, %v587_v20  ;;  %v586_v27 = vld [vmem:[#allocation2 + $0xf40] sm:$0xff]  ;;  %v1420_v20 = vld [vmem:[#allocation7 + $0x28] sm:$0xff]  ;;  %v2284_v24 = vpack.c.bf16 %v1417_v19, %v1415_v15 }
 0x11c   :  { %2123 = vmatprep.subr.bf16.mxu1 %v2122_v31  ;;  %v336_v31 = vld [vmem:[#allocation2 + $0x770] sm:$0xff]  ;;  %v2016_v36 = vpack.c.bf16 %v590_v18, %v586_v27  ;;  %v1422_v21 = vld [vmem:[#allocation7 + $0x38] sm:$0xff] }
 0x11d   :  { %v1424_v27 = vld [vmem:[#allocation7 + $0x48] sm:$0xff]  ;;  %v381_v18 = vld [vmem:[#allocation2 + $0x8d8] sm:$0xff] }
 0x11e   :  { %1997 = vmatpush1.bf16.msra.mxu0 %v1996_v37  ;;  %v2144_v37 = vpack.c.bf16 %v336_v31, %v332_v29  ;;  %v385_v29 = vld [vmem:[#allocation2 + $0x8f8] sm:$0xff]  ;;  %v404_v6 = vld [vmem:[#allocation2 + $0x990] sm:$0xff] }
 0x11f   :  { %2125 = vmatpush1.bf16.msra.mxu1 %v2124_v38  ;;  %1999 = vmatprep.subr.bf16.mxu0 %v1998_v23  ;;  %v2018_v38 = vpack.c.bf16 %v599_v33, %v595_v32  ;;  %v594_v23 = vld [vmem:[#allocation2 + $0xf80] sm:$0xff] }
 0x120   :  { %2127 = vmatprep.subr.bf16.mxu1 %v2126_v42  ;;  %v344_v42 = vld [vmem:[#allocation2 + $0x7b0] sm:$0xff]  ;;  %v2020_v47 = vpack.c.bf16 %v598_v39, %v594_v23  ;;  %v1430_v23 = vld [vmem:[#allocation7 + $0x78] sm:$0xff] }
 0x121   :  { %v389_v39 = vld [vmem:[#allocation2 + $0x918] sm:$0xff] }
 0x122   :  { %2001 = vmatpush1.bf16.msra.mxu0 %v2000_v48  ;;  %v2148_v48 = vpack.c.bf16 %v344_v42, %v340_v40  ;;  %v393_v40 = vld [vmem:[#allocation2 + $0x938] sm:$0xff] }
 0x123   :  { %2129 = vmatpush1.bf16.msra.mxu1 %v2128_v49  ;;  %2003 = vmatprep.subr.bf16.mxu0 %v2002_v50  ;;  %v2022_v49 = vpack.c.bf16 %v607_v44, %v603_v43  ;;  %v602_v50 = vld [vmem:[#allocation2 + $0xfc0] sm:$0xff]  ;;  %v388_v43 = vld [vmem:[#allocation2 + $0x910] sm:$0xff] }
 0x124   :  { %2131 = vmatprep.subr.bf16.mxu1 %v2130_v55  ;;  %v352_v55 = vld [vmem:[#allocation2 + $0x7f0] sm:$0xff]  ;;  %v2024_v58 = vpack.c.bf16 %v606_v51, %v602_v50  ;;  %v1434_v50 = vld [vmem:[#allocation7 + $0x98] sm:$0xff] }
 0x125   :  { %v2152_v59 = vpack.c.bf16 %v352_v55, %v348_v54  ;;  %v397_v51 = vld [vmem:[#allocation2 + $0x958] sm:$0xff]  ;;  %v2296_v54 = vpack.c.bf16 %v1429_v46, %v1427_v45  ;;  %v1447_v46 = vld [vmem:[#allocation7 + $0x100] sm:$0xff] }
 0x126   :  { %2005 = vmatpush1.bf16.msra.mxu0 %v2004_v61  ;;  %v356_v61 = vld [vmem:[#allocation2 + $0x810] sm:$0xff]  ;;  %v1442_v15 = vld [vmem:[#allocation7 + $0xd8] sm:$0xff] }
 0x127   :  { %2133 = vmatpush1.bf16.msra.mxu1 %v2132_v62  ;;  %2007 = vmatprep.subr.bf16.mxu0 %v2006_v0  ;;  %v360_v62 = vld [vmem:[#allocation2 + $0x830] sm:$0xff]  ;;  %v365_v0 = vld [vmem:[#allocation2 + $0x858] sm:$0xff] }
 0x128   :  { %2135 = vmatprep.subr.bf16.mxu1 %v2134_v4  ;;  %v2156_v3 = vpack.c.bf16 %v360_v62, %v356_v61  ;;  %v2158_v4 = vpack.c.bf16 %v369_v1, %v365_v0  ;;  %v400_v61 = vld [vmem:[#allocation2 + $0x970] sm:$0xff]  ;;  %v1438_v0 = vld [vmem:[#allocation7 + $0xb8] sm:$0xff] }
 0x129   :  { %v1436_v62 = vld [vmem:[#allocation7 + $0xa8] sm:$0xff]  ;;  %v405_v1 = vld [vmem:[#allocation2 + $0x998] sm:$0xff]  ;;  %v2176_v5 = vpack.c.bf16 %v400_v61, %v396_v56 }
 0x12a   :  { %2009 = vmatpush1.bf16.msra.mxu0 %v2008_v10  ;;  %v372_v10 = vld [vmem:[#allocation2 + $0x890] sm:$0xff]  ;;  %v2302_v7 = vpack.c.bf16 %v1438_v0, %v1436_v62 }
 0x12b   :  { %2137 = vmatpush1.bf16.msra.mxu1 %v2136_v11  ;;  %2011 = vmatprep.subr.bf16.mxu0 %v2010_v13  ;;  %v376_v11 = vld [vmem:[#allocation2 + $0x8b0] sm:$0xff] }
 0x12c   :  { %2139 = vmatprep.subr.bf16.mxu1 %v2138_v17  ;;  %v1416_v13 = vld [vmem:[#allocation7 + $0x8] sm:$0xff]  ;;  %v2164_v32 = vpack.c.bf16 %v376_v11, %v372_v10 }
 0x12d   :  { %v2282_v17 = vpack.c.bf16 %v1418_v14, %v1416_v13  ;;  %v408_v11 = vld [vmem:[#allocation2 + $0x9b0] sm:$0xff] }
 0x12e   :  { %2013 = vmatpush1.bf16.msra.mxu0 %v2012_v25  ;;  %v2286_v25 = vpack.c.bf16 %v1422_v21, %v1420_v20  ;;  %v1440_v14 = vld [vmem:[#allocation7 + $0xc8] sm:$0xff]  ;;  %v2180_v21 = vpack.c.bf16 %v408_v11, %v404_v6 }
 0x12f   :  { %2141 = vmatpush1.bf16.msra.mxu1 %v2140_v26  ;;  %2015 = vmatprep.subr.bf16.mxu0 %v2014_v52  ;;  %v1419_v26 = vld [vmem:[#allocation7 + $0x20] sm:$0xff]  ;;  %v1421_v52 = vld [vmem:[#allocation7 + $0x30] sm:$0xff]  ;;  %v1456_v0 = vld [vmem:[#allocation7 + $0x148] sm:$0xff] }
 0x130   :  { %2143 = vmatprep.subr.bf16.mxu1 %v2142_v30  ;;  %v1426_v30 = vld [vmem:[#allocation7 + $0x58] sm:$0xff]  ;;  %v2288_v31 = vpack.c.bf16 %v1421_v52, %v1419_v26  ;;  %v1441_v26 = vld [vmem:[#allocation7 + $0xd0] sm:$0xff] }
 0x131   :  { %v2290_v33 = vpack.c.bf16 %v1426_v30, %v1424_v27  ;;  %v416_v27 = vld [vmem:[#allocation2 + $0x9f0] sm:$0xff]  ;;  %v421_v30 = vld [vmem:[#allocation2 + $0xa18] sm:$0xff] }
 0x132   :  { %2017 = vmatpush1.bf16.msra.mxu0 %v2016_v36  ;;  %v2166_v36 = vpack.c.bf16 %v385_v29, %v381_v18  ;;  %v1444_v18 = vld [vmem:[#allocation7 + $0xe8] sm:$0xff]  ;;  %v1446_v29 = vld [vmem:[#allocation7 + $0xf8] sm:$0xff] }
 0x133   :  { %2145 = vmatpush1.bf16.msra.mxu1 %v2144_v37  ;;  %2019 = vmatprep.subr.bf16.mxu0 %v2018_v38  ;;  %v384_v37 = vld [vmem:[#allocation2 + $0x8f0] sm:$0xff] }
 0x134   :  { %2147 = vmatprep.subr.bf16.mxu1 %v2146_v41  ;;  %v1428_v38 = vld [vmem:[#allocation7 + $0x68] sm:$0xff]  ;;  %v2292_v41 = vpack.c.bf16 %v1425_v35, %v1423_v34  ;;  %v2310_v34 = vpack.c.bf16 %v1446_v29, %v1444_v18  ;;  %v1443_v35 = vld [vmem:[#allocation7 + $0xe0] sm:$0xff] }
 0x135   :  { %v2294_v44 = vpack.c.bf16 %v1430_v23, %v1428_v38  ;;  %v424_v38 = vld [vmem:[#allocation2 + $0xa30] sm:$0xff] }
 0x136   :  { %2021 = vmatpush1.bf16.msra.mxu0 %v2020_v47  ;;  %v2170_v47 = vpack.c.bf16 %v393_v40, %v389_v39  ;;  %v1448_v23 = vld [vmem:[#allocation7 + $0x108] sm:$0xff]  ;;  %v1450_v39 = vld [vmem:[#allocation7 + $0x118] sm:$0xff] }
 0x137   :  { %2149 = vmatpush1.bf16.msra.mxu1 %v2148_v48  ;;  %2023 = vmatprep.subr.bf16.mxu0 %v2022_v49  ;;  %v392_v48 = vld [vmem:[#allocation2 + $0x930] sm:$0xff]  ;;  %v429_v40 = vld [vmem:[#allocation2 + $0xa58] sm:$0xff]  ;;  %v2314_v45 = vpack.c.bf16 %v1450_v39, %v1448_v23 }
 0x138   :  { %2151 = vmatprep.subr.bf16.mxu1 %v2150_v53  ;;  %v1432_v49 = vld [vmem:[#allocation7 + $0x88] sm:$0xff]  ;;  %v401_v53 = vld [vmem:[#allocation2 + $0x978] sm:$0xff]  ;;  %v2172_v55 = vpack.c.bf16 %v392_v48, %v388_v43 }
 0x139   :  { %v2298_v57 = vpack.c.bf16 %v1434_v50, %v1432_v49  ;;  %v432_v49 = vld [vmem:[#allocation2 + $0xa70] sm:$0xff] }
 0x13a   :  { %2025 = vmatpush1.bf16.msra.mxu0 %v2024_v58  ;;  %v1431_v58 = vld [vmem:[#allocation7 + $0x80] sm:$0xff]  ;;  %v1452_v50 = vld [vmem:[#allocation7 + $0x128] sm:$0xff] }
 0x13b   :  { %2153 = vmatpush1.bf16.msra.mxu1 %v2152_v59  ;;  %2283 = vmatprep.subr.bf16.mxu0 %v2282_v17  ;;  %v1433_v59 = vld [vmem:[#allocation7 + $0x90] sm:$0xff]  ;;  %v1464_v29 = vld [vmem:[#allocation7 + $0x188] sm:$0xff] }
 0x13c   :  { %2155 = vmatprep.subr.bf16.mxu1 %v2154_v60  ;;  %v2174_v60 = vpack.c.bf16 %v401_v53, %v397_v51  ;;  %v417_v17 = vld [vmem:[#allocation2 + $0x9f8] sm:$0xff]  ;;  %v440_v62 = vld [vmem:[#allocation2 + $0xab0] sm:$0xff] }
 0x13d   :  { %1095 = vmatmul.mubr.f32.vlgmr.msra.gmra.mrb[2].mxu0 %v2728_v2  ;;  %v1454_v51 = vld [vmem:[#allocation7 + $0x138] sm:$0xff]  ;;  %v456_v18 = vld [vmem:[#allocation2 + $0xb30] sm:$0xff] }
 0x13e   :  { %1237 = vmatmul.mubr.f32.vlgmr.msra.gmra.mrb[0].mxu1 %v2440_v9  ;;  %2285 = vmatpush1.bf16.msra.mxu0 %v2284_v24  ;;  %v1437_v9 = vld [vmem:[#allocation7 + $0xb0] sm:$0xff]  ;;  %v2306_v24 = vpack.c.bf16 %v1442_v15, %v1440_v14  ;;  %v1460_v15 = vld [vmem:[#allocation7 + $0x168] sm:$0xff] }
 0x13f   :  { %2157 = vmatpush1.bf16.msra.mxu1 %v2156_v3  ;;  %1307 = vmatprep.mubr.f32.mxu1 %v2708_v28  ;;  %v380_v28 = vld [vmem:[#allocation2 + $0x8d0] sm:$0xff]  ;;  %v409_v3 = vld [vmem:[#allocation2 + $0x9b8] sm:$0xff]  ;;  %v2304_v20 = vpack.c.bf16 %v1437_v9, %v1435_v8  ;;  %v1455_v9 = vld [vmem:[#allocation7 + $0x140] sm:$0xff] }
 0x140   :  { %2159 = vmatprep.subr.bf16.mxu1 %v2158_v4  ;;  %2287 = vmatprep.subr.bf16.mxu0 %v2286_v25  ;;  %v2168_v42 = vpack.c.bf16 %v384_v37, %v380_v28  ;;  %v2300_v4 = vpack.c.bf16 %v1433_v59, %v1431_v58  ;;  %v2178_v10 = vpack.c.bf16 %v409_v3, %v405_v1  ;;  %v1439_v25 = vld [vmem:[#allocation7 + $0xc0] sm:$0xff]  ;;  %v437_v53 = vld [vmem:[#allocation2 + $0xa98] sm:$0xff]  ;;  %v448_v14 = vld [vmem:[#allocation2 + $0xaf0] sm:$0xff] }
 0x141   :  { %v2318_v58 = vpack.c.bf16 %v1454_v51, %v1452_v50  ;;  %v1451_v59 = vld [vmem:[#allocation7 + $0x120] sm:$0xff]  ;;  %v1458_v1 = vld [vmem:[#allocation7 + $0x158] sm:$0xff]  ;;  %v464_v23 = vld [vmem:[#allocation2 + $0xb70] sm:$0xff] }
 0x142   :  { %2289 = vmatpush1.bf16.msra.mxu0 %v2288_v31  ;;  %v425_v31 = vld [vmem:[#allocation2 + $0xa38] sm:$0xff]  ;;  %v2322_v8 = vpack.c.bf16 %v1458_v1, %v1456_v0  ;;  %v1468_v39 = vld [vmem:[#allocation7 + $0x1a8] sm:$0xff] }
 0x143   :  { %2161 = vmatpush1.bf16.msra.mxu1 %v2160_v16  ;;  %2291 = vmatprep.subr.bf16.mxu0 %v2290_v33  ;;  %v413_v16 = vld [vmem:[#allocation2 + $0x9d8] sm:$0xff]  ;;  %v420_v33 = vld [vmem:[#allocation2 + $0xa10] sm:$0xff]  ;;  %v2186_v37 = vpack.c.bf16 %v425_v31, %v421_v30 }
 0x144   :  { %2163 = vmatprep.subr.bf16.mxu1 %v2162_v22  ;;  %v412_v22 = vld [vmem:[#allocation2 + $0x9d0] sm:$0xff]  ;;  %v2182_v52 = vpack.c.bf16 %v417_v17, %v413_v16  ;;  %v2188_v43 = vpack.c.bf16 %v424_v38, %v420_v33  ;;  %v445_v3 = vld [vmem:[#allocation2 + $0xad8] sm:$0xff] }
 0x145   :  { %v2184_v28 = vpack.c.bf16 %v416_v27, %v412_v22  ;;  %v1462_v16 = vld [vmem:[#allocation7 + $0x178] sm:$0xff]  ;;  %v472_v50 = vld [vmem:[#allocation2 + $0xbb0] sm:$0xff] }
 0x146   :  { %2293 = vmatpush1.bf16.msra.mxu0 %v2292_v41  ;;  %v433_v41 = vld [vmem:[#allocation2 + $0xa78] sm:$0xff]  ;;  %v484_v0 = vld [vmem:[#allocation2 + $0xc10] sm:$0xff] }
 0x147   :  { %2165 = vmatpush1.bf16.msra.mxu1 %v2164_v32  ;;  %2295 = vmatprep.subr.bf16.mxu0 %v2294_v44  ;;  %v2308_v32 = vpack.c.bf16 %v1441_v26, %v1439_v25  ;;  %v428_v44 = vld [vmem:[#allocation2 + $0xa50] sm:$0xff]  ;;  %v2190_v48 = vpack.c.bf16 %v433_v41, %v429_v40  ;;  %v453_v17 = vld [vmem:[#allocation2 + $0xb18] sm:$0xff]  ;;  %v2326_v25 = vpack.c.bf16 %v1462_v16, %v1460_v15  ;;  %v1459_v26 = vld [vmem:[#allocation7 + $0x160] sm:$0xff] }
 0x148   :  { %2167 = vmatprep.subr.bf16.mxu1 %v2166_v36  ;;  %v1445_v36 = vld [vmem:[#allocation7 + $0xf0] sm:$0xff]  ;;  %v2192_v56 = vpack.c.bf16 %v432_v49, %v428_v44  ;;  %v1466_v30 = vld [vmem:[#allocation7 + $0x198] sm:$0xff] }
 0x149   :  { %v461_v31 = vld [vmem:[#allocation2 + $0xb58] sm:$0xff]  ;;  %v468_v49 = vld [vmem:[#allocation2 + $0xb90] sm:$0xff] }
 0x14a   :  { %2297 = vmatpush1.bf16.msra.mxu0 %v2296_v54  ;;  %v441_v54 = vld [vmem:[#allocation2 + $0xab8] sm:$0xff]  ;;  %v488_v1 = vld [vmem:[#allocation2 + $0xc30] sm:$0xff] }
 0x14b   :  { %2169 = vmatpush1.bf16.msra.mxu1 %v2168_v42  ;;  %2299 = vmatprep.subr.bf16.mxu0 %v2298_v57  ;;  %v2312_v42 = vpack.c.bf16 %v1445_v36, %v1443_v35  ;;  %v436_v57 = vld [vmem:[#allocation2 + $0xa90] sm:$0xff]  ;;  %v2194_v61 = vpack.c.bf16 %v441_v54, %v437_v53  ;;  %v2330_v35 = vpack.c.bf16 %v1466_v30, %v1464_v29  ;;  %v1463_v36 = vld [vmem:[#allocation7 + $0x180] sm:$0xff]  ;;  %v1470_v40 = vld [vmem:[#allocation7 + $0x1b8] sm:$0xff] }
 0x14c   :  { %2171 = vmatprep.subr.bf16.mxu1 %v2170_v47  ;;  %v1449_v47 = vld [vmem:[#allocation7 + $0x110] sm:$0xff]  ;;  %v2196_v6 = vpack.c.bf16 %v440_v62, %v436_v57 }
 0x14d   :  { %v469_v41 = vld [vmem:[#allocation2 + $0xb98] sm:$0xff]  ;;  %v476_v57 = vld [vmem:[#allocation2 + $0xbd0] sm:$0xff] }
 0x14e   :  { %2301 = vmatpush1.bf16.msra.mxu0 %v2300_v4  ;;  %v449_v4 = vld [vmem:[#allocation2 + $0xaf8] sm:$0xff]  ;;  %v500_v15 = vld [vmem:[#allocation2 + $0xc90] sm:$0xff] }
 0x14f   :  { %2173 = vmatpush1.bf16.msra.mxu1 %v2172_v55  ;;  %2303 = vmatprep.subr.bf16.mxu0 %v2302_v7  ;;  %v2316_v55 = vpack.c.bf16 %v1449_v47, %v1447_v46  ;;  %v444_v7 = vld [vmem:[#allocation2 + $0xad0] sm:$0xff]  ;;  %v2198_v11 = vpack.c.bf16 %v449_v4, %v445_v3  ;;  %v1467_v46 = vld [vmem:[#allocation7 + $0x1a0] sm:$0xff]  ;;  %v477_v51 = vld [vmem:[#allocation2 + $0xbd8] sm:$0xff] }
 0x150   :  { %2175 = vmatprep.subr.bf16.mxu1 %v2174_v60  ;;  %v2735_v13 = vpop.f32.mrb[0].mxu0  ;;  %v1453_v60 = vld [vmem:[#allocation7 + $0x130] sm:$0xff]  ;;  %v2200_v22 = vpack.c.bf16 %v448_v14, %v444_v7 }
 0x151   :  { %v2737_v19 = vpop.f32.mrb[1].mxu0  ;;  %v1469_v47 = vld [vmem:[#allocation7 + $0x1b0] sm:$0xff] }
 0x152   :  { %2305 = vmatpush1.bf16.msra.mxu0 %v2304_v20  ;;  %v457_v20 = vld [vmem:[#allocation2 + $0xb38] sm:$0xff]  ;;  %v2336_v54 = vpack.c.bf16 %v1469_v47, %v1467_v46  ;;  %v492_v7 = vld [vmem:[#allocation2 + $0xc50] sm:$0xff] }
 0x153   :  { %2177 = vmatpush1.bf16.msra.mxu1 %v2176_v5  ;;  %2307 = vmatprep.subr.bf16.mxu0 %v2306_v24  ;;  %v2320_v5 = vpack.c.bf16 %v1453_v60, %v1451_v59  ;;  %v452_v24 = vld [vmem:[#allocation2 + $0xb10] sm:$0xff]  ;;  %v2202_v27 = vpack.c.bf16 %v457_v20, %v453_v17  ;;  %v481_v53 = vld [vmem:[#allocation2 + $0xbf8] sm:$0xff] }
 0x154   :  { %2179 = vmatprep.subr.bf16.mxu1 %v2178_v10  ;;  %v1457_v10 = vld [vmem:[#allocation7 + $0x150] sm:$0xff]  ;;  %v2204_v33 = vpack.c.bf16 %v456_v18, %v452_v24 }
 0x155   :  { %v485_v59 = vld [vmem:[#allocation2 + $0xc18] sm:$0xff]  ;;  %v504_v16 = vld [vmem:[#allocation2 + $0xcb0] sm:$0xff] }
 0x156   :  { %2309 = vmatpush1.bf16.msra.mxu0 %v2308_v32  ;;  %v465_v32 = vld [vmem:[#allocation2 + $0xb78] sm:$0xff]  ;;  %v508_v24 = vld [vmem:[#allocation2 + $0xcd0] sm:$0xff] }
 0x157   :  { %2181 = vmatpush1.bf16.msra.mxu1 %v2180_v21  ;;  %2311 = vmatprep.subr.bf16.mxu0 %v2310_v34  ;;  %v2324_v21 = vpack.c.bf16 %v1457_v10, %v1455_v9  ;;  %v460_v34 = vld [vmem:[#allocation2 + $0xb50] sm:$0xff]  ;;  %v2206_v38 = vpack.c.bf16 %v465_v32, %v461_v31  ;;  %v489_v60 = vld [vmem:[#allocation2 + $0xc38] sm:$0xff] }
 0x158   :  { %2183 = vmatprep.subr.bf16.mxu1 %v2182_v52  ;;  %v1461_v52 = vld [vmem:[#allocation7 + $0x170] sm:$0xff]  ;;  %v2208_v44 = vpack.c.bf16 %v464_v23, %v460_v34  ;;  %v2218_v62 = vpack.c.bf16 %v489_v60, %v485_v59  ;;  %v1474_v23 = vld [vmem:[#allocation7 + $0x1d8] sm:$0xff]  ;;  %v1475_v59 = vld [vmem:[#allocation7 + $0x1e0] sm:$0xff] }
 0x159   :  { %v493_v3 = vld [vmem:[#allocation2 + $0xc58] sm:$0xff]  ;;  %v516_v18 = vld [vmem:[#allocation2 + $0xd10] sm:$0xff] }
 0x15a   :  { %2313 = vmatpush1.bf16.msra.mxu0 %v2312_v42  ;;  %v473_v42 = vld [vmem:[#allocation2 + $0xbb8] sm:$0xff] }
 0x15b   :  { %2185 = vmatpush1.bf16.msra.mxu1 %v2184_v28  ;;  %2315 = vmatprep.subr.bf16.mxu0 %v2314_v45  ;;  %v2328_v28 = vpack.c.bf16 %v1461_v52, %v1459_v26  ;;  %v2334_v45 = vpack.c.bf16 %v1470_v40, %v1468_v39  ;;  %v497_v4 = vld [vmem:[#allocation2 + $0xc78] sm:$0xff]  ;;  %v536_v40 = vld [vmem:[#allocation2 + $0xdb0] sm:$0xff] }
 0x15c   :  { %2187 = vmatprep.subr.bf16.mxu1 %v2186_v37  ;;  %v1465_v37 = vld [vmem:[#allocation7 + $0x190] sm:$0xff] }
 0x15d   :  { %v501_v9 = vld [vmem:[#allocation2 + $0xc98] sm:$0xff] }
 0x15e   :  { %2317 = vmatpush1.bf16.msra.mxu0 %v2316_v55  ;;  %v2212_v55 = vpack.c.bf16 %v472_v50, %v468_v49  ;;  %v505_v10 = vld [vmem:[#allocation2 + $0xcb8] sm:$0xff] }
 0x15f   :  { %2189 = vmatpush1.bf16.msra.mxu1 %v2188_v43  ;;  %2319 = vmatprep.subr.bf16.mxu0 %v2318_v58  ;;  %v2332_v43 = vpack.c.bf16 %v1465_v37, %v1463_v36  ;;  %v480_v58 = vld [vmem:[#allocation2 + $0xbf0] sm:$0xff]  ;;  %v2226_v14 = vpack.c.bf16 %v505_v10, %v501_v9  ;;  %v509_v17 = vld [vmem:[#allocation2 + $0xcd8] sm:$0xff] }
 0x160   :  { %2191 = vmatprep.subr.bf16.mxu1 %v2190_v48  ;;  %v2210_v48 = vpack.c.bf16 %v473_v42, %v469_v41  ;;  %v513_v20 = vld [vmem:[#allocation2 + $0xcf8] sm:$0xff]  ;;  %v532_v37 = vld [vmem:[#allocation2 + $0xd90] sm:$0xff]  ;;  %v1471_v42 = vld [vmem:[#allocation7 + $0x1c0] sm:$0xff] }
 0x161   :  { %v517_v26 = vld [vmem:[#allocation2 + $0xd18] sm:$0xff] }
 0x162   :  { %2321 = vmatpush1.bf16.msra.mxu0 %v2320_v5  ;;  %v2220_v5 = vpack.c.bf16 %v488_v1, %v484_v0  ;;  %v521_v52 = vld [vmem:[#allocation2 + $0xd38] sm:$0xff]  ;;  %v548_v1 = vld [vmem:[#allocation2 + $0xe10] sm:$0xff] }
 0x163   :  { %2193 = vmatpush1.bf16.msra.mxu1 %v2192_v56  ;;  %2323 = vmatprep.subr.bf16.mxu0 %v2322_v8  ;;  %v2214_v56 = vpack.c.bf16 %v481_v53, %v477_v51  ;;  %v496_v8 = vld [vmem:[#allocation2 + $0xc70] sm:$0xff]  ;;  %v525_v29 = vld [vmem:[#allocation2 + $0xd58] sm:$0xff]  ;;  %v2244_v51 = vpack.c.bf16 %v536_v40, %v532_v37 }
 0x164   :  { %2195 = vmatprep.subr.bf16.mxu1 %v2194_v61  ;;  %v2216_v61 = vpack.c.bf16 %v480_v58, %v476_v57  ;;  %v529_v30 = vld [vmem:[#allocation2 + $0xd78] sm:$0xff]  ;;  %v540_v53 = vld [vmem:[#allocation2 + $0xdd0] sm:$0xff] }
 0x165   :  { %v2238_v32 = vpack.c.bf16 %v529_v30, %v525_v29  ;;  %v533_v34 = vld [vmem:[#allocation2 + $0xd98] sm:$0xff]  ;;  %v544_v57 = vld [vmem:[#allocation2 + $0xdf0] sm:$0xff] }
 0x166   :  { %2325 = vmatpush1.bf16.msra.mxu0 %v2324_v21  ;;  %v2228_v21 = vpack.c.bf16 %v504_v16, %v500_v15  ;;  %v545_v46 = vld [vmem:[#allocation2 + $0xdf8] sm:$0xff]  ;;  %v2248_v0 = vpack.c.bf16 %v544_v57, %v540_v53  ;;  %v592_v37 = vld [vmem:[#allocation2 + $0xf70] sm:$0xff]  ;;  %v1387_v53 = vlaneseq }
 0x167   :  { %2197 = vmatpush1.bf16.msra.mxu1 %v2196_v6  ;;  %2327 = vmatprep.subr.bf16.mxu0 %v2326_v25  ;;  %v2222_v6 = vpack.c.bf16 %v497_v4, %v493_v3  ;;  %v512_v25 = vld [vmem:[#allocation2 + $0xcf0] sm:$0xff]  ;;  %v557_v4 = vld [vmem:[#allocation2 + $0xe58] sm:$0xff] }
 0x168   :  { %2199 = vmatprep.subr.bf16.mxu1 %v2198_v11  ;;  %v2224_v11 = vpack.c.bf16 %v496_v8, %v492_v7  ;;  %v1477_v60 = vld [vmem:[#allocation7 + $0x1f0] sm:$0xff]  ;;  %v1482_v7 = vld [vmem:[#allocation7 + $0x218] sm:$0xff] }
 0x169   :  { %v552_v3 = vld [vmem:[#allocation2 + $0xe30] sm:$0xff]  ;;  %v565_v15 = vld [vmem:[#allocation2 + $0xe98] sm:$0xff] }
 0x16a   :  { %2329 = vmatpush1.bf16.msra.mxu0 %v2328_v28  ;;  %v524_v28 = vld [vmem:[#allocation2 + $0xd50] sm:$0xff]  ;;  %v2252_v9 = vpack.c.bf16 %v552_v3, %v548_v1  ;;  %v569_v16 = vld [vmem:[#allocation2 + $0xeb8] sm:$0xff] }
 0x16b   :  { %2201 = vmatpush1.bf16.msra.mxu1 %v2200_v22  ;;  %2331 = vmatprep.subr.bf16.mxu0 %v2330_v35  ;;  %v2230_v22 = vpack.c.bf16 %v513_v20, %v509_v17  ;;  %v537_v35 = vld [vmem:[#allocation2 + $0xdb8] sm:$0xff]  ;;  %v2258_v20 = vpack.c.bf16 %v569_v16, %v565_v15  ;;  %v1484_v3 = vld [vmem:[#allocation7 + $0x228] sm:$0xff]  ;;  %v1487_v15 = vld [vmem:[#allocation7 + $0x240] sm:$0xff] }
 0x16c   :  { %2203 = vmatprep.subr.bf16.mxu1 %v2202_v27  ;;  %v2234_v27 = vpack.c.bf16 %v521_v52, %v517_v26  ;;  %v2242_v39 = vpack.c.bf16 %v537_v35, %v533_v34  ;;  %v1489_v16 = vld [vmem:[#allocation7 + $0x250] sm:$0xff] }
 0x16e   :  { %2333 = vmatpush1.bf16.msra.mxu0 %v2332_v43  ;;  %v1473_v43 = vld [vmem:[#allocation7 + $0x1d0] sm:$0xff] }
 0x16f   :  { %2205 = vmatpush1.bf16.msra.mxu1 %v2204_v33  ;;  %2335 = vmatprep.subr.bf16.mxu0 %v2334_v45  ;;  %v528_v33 = vld [vmem:[#allocation2 + $0xd70] sm:$0xff]  ;;  %v541_v45 = vld [vmem:[#allocation2 + $0xdd8] sm:$0xff]  ;;  %v2340_v47 = vpack.c.bf16 %v1473_v43, %v1471_v42 }
 0x170   :  { %2207 = vmatprep.subr.bf16.mxu1 %v2206_v38  ;;  %v2240_v36 = vpack.c.bf16 %v528_v33, %v524_v28  ;;  %v1472_v38 = vld [vmem:[#allocation7 + $0x1c8] sm:$0xff]  ;;  %v589_v28 = vld [vmem:[#allocation2 + $0xf58] sm:$0xff] }
 0x171   :  { %v2338_v41 = vpack.c.bf16 %v1474_v23, %v1472_v38  ;;  %v593_v33 = vld [vmem:[#allocation2 + $0xf78] sm:$0xff]  ;;  %v600_v42 = vld [vmem:[#allocation2 + $0xfb0] sm:$0xff] }
 0x172   :  { %2337 = vmatpush1.bf16.msra.mxu0 %v2336_v54  ;;  %v1476_v54 = vld [vmem:[#allocation7 + $0x1e8] sm:$0xff]  ;;  %v2270_v35 = vpack.c.bf16 %v593_v33, %v589_v28  ;;  %v597_v38 = vld [vmem:[#allocation2 + $0xf98] sm:$0xff]  ;;  %v1499_v28 = vld [vmem:[#allocation7 + $0x2a0] sm:$0xff] }
 0x173   :  { %2209 = vmatpush1.bf16.msra.mxu1 %v2208_v44  ;;  %2339 = vmatprep.subr.bf16.mxu0 %v2338_v41  ;;  %v601_v23 = vld [vmem:[#allocation2 + $0xfb8] sm:$0xff]  ;;  %v596_v41 = vld [vmem:[#allocation2 + $0xf90] sm:$0xff] }
 0x174   :  { %2211 = vmatprep.subr.bf16.mxu1 %v2210_v48  ;;  %v2274_v40 = vpack.c.bf16 %v601_v23, %v597_v38  ;;  %v605_v43 = vld [vmem:[#allocation2 + $0xfd8] sm:$0xff]  ;;  %v1503_v38 = vld [vmem:[#allocation7 + $0x2c0] sm:$0xff] }
 0x175   :  { %v1501_v33 = vld [vmem:[#allocation7 + $0x2b0] sm:$0xff] }
 0x176   :  { %2341 = vmatpush1.bf16.msra.mxu0 %v2340_v47  ;;  %v604_v47 = vld [vmem:[#allocation2 + $0xfd0] sm:$0xff] }
 0x177   :  { %2213 = vmatpush1.bf16.msra.mxu1 %v2212_v55  ;;  %v1478_v55 = vld [vmem:[#allocation7 + $0x1f8] sm:$0xff]  ;;  %v1505_v23 = vld [vmem:[#allocation7 + $0x2d0] sm:$0xff] }
 0x178   :  { %2215 = vmatprep.subr.bf16.mxu1 %v2214_v56  ;;  %v2246_v56 = vpack.c.bf16 %v545_v46, %v541_v45  ;;  %v2342_v58 = vpack.c.bf16 %v1478_v55, %v1476_v54  ;;  %v2276_v45 = vpack.c.bf16 %v600_v42, %v596_v41  ;;  %v2748_v54 = vshrl.u32 %v1387_v53, 7  ;;  %v1513_v53 = vld [vmem:[#allocation7 + $0x310] sm:$0xff] }
 0x179   :  { %v2372_v41 = vpack.c.bf16 %v1505_v23, %v1503_v38 }
 0x17a   :  { %2343 = vmatprep.subr.bf16.mxu0 %v2342_v58  ;;  %v1389_v55 = vsub.s32 0, %v2748_v54  ;;  %v1393_v57 = vsub.s32 1, %v2748_v54 }
 0x17b   :  { %2217 = vmatpush1.bf16.msra.mxu1 %v2216_v61  ;;  %v549_v61 = vld [vmem:[#allocation2 + $0xe18] sm:$0xff] }
 0x17c   :  { %2219 = vmatprep.subr.bf16.mxu1 %v2218_v62  ;;  %v2344_v62 = vpack.c.bf16 %v1477_v60, %v1475_v59 }
 0x17e   :  { %1308 = vmatmul.mubr.f32.vlgmr.msra.gmra.mrb[0].mxu1 %v2714_v63  ;;  %v2232_v63 = vpack.c.bf16 %v512_v25, %v508_v24  ;;  %2345 = vmatpush1.bf16.msra.mxu0 %v2344_v62  ;;  %v573_v24 = vld [vmem:[#allocation2 + $0xed8] sm:$0xff] }
 0x17f   :  { %2221 = vmatpush1.bf16.msra.mxu1 %v2220_v5  ;;  %1378 = vmatprep.mubr.f32.mxu1 %v2720_v12  ;;  %v520_v12 = vld [vmem:[#allocation2 + $0xd30] sm:$0xff]  ;;  %v561_v5 = vld [vmem:[#allocation2 + $0xe78] sm:$0xff] }
 0x180   :  { %2223 = vmatprep.subr.bf16.mxu1 %v2222_v6  ;;  %v2236_v31 = vpack.c.bf16 %v520_v12, %v516_v18  ;;  %v1480_v6 = vld [vmem:[#allocation7 + $0x208] sm:$0xff]  ;;  %v2254_v10 = vpack.c.bf16 %v561_v5, %v557_v4  ;;  %v577_v25 = vld [vmem:[#allocation2 + $0xef8] sm:$0xff] }
 0x181   :  { %v2346_v8 = vpack.c.bf16 %v1482_v7, %v1480_v6  ;;  %v2262_v52 = vpack.c.bf16 %v577_v25, %v573_v24  ;;  %v581_v18 = vld [vmem:[#allocation2 + $0xf18] sm:$0xff]  ;;  %v1491_v24 = vld [vmem:[#allocation7 + $0x260] sm:$0xff] }
 0x182   :  { %v585_v12 = vld [vmem:[#allocation2 + $0xf38] sm:$0xff] }
 0x183   :  { %2225 = vmatpush1.bf16.msra.mxu1 %v2224_v11  ;;  %v556_v11 = vld [vmem:[#allocation2 + $0xe50] sm:$0xff]  ;;  %2347 = vmatprep.subr.bf16.mxu0 %v2346_v8  ;;  %v2266_v30 = vpack.c.bf16 %v585_v12, %v581_v18  ;;  %v1486_v4 = vld [vmem:[#allocation7 + $0x238] sm:$0xff]  ;;  %v1495_v18 = vld [vmem:[#allocation7 + $0x280] sm:$0xff] }
 0x184   :  { %2227 = vmatprep.subr.bf16.mxu1 %v2226_v14  ;;  %v560_v14 = vld [vmem:[#allocation2 + $0xe70] sm:$0xff]  ;;  %v2350_v8 = vpack.c.bf16 %v1486_v4, %v1484_v3  ;;  %v1519_v3 = vld [vmem:[#allocation7 + $0x340] sm:$0xff] }
 0x185   :  { %v2256_v17 = vpack.c.bf16 %v560_v14, %v556_v11  ;;  %v1488_v11 = vld [vmem:[#allocation7 + $0x248] sm:$0xff]  ;;  %v1490_v14 = vld [vmem:[#allocation7 + $0x258] sm:$0xff]  ;;  %v1493_v25 = vld [vmem:[#allocation7 + $0x270] sm:$0xff] }
 0x186   :  { %v1497_v12 = vld [vmem:[#allocation7 + $0x290] sm:$0xff] }
 0x187   :  { %2229 = vmatpush1.bf16.msra.mxu1 %v2228_v21  ;;  %v564_v21 = vld [vmem:[#allocation2 + $0xe90] sm:$0xff] }
 0x188   :  { %2231 = vmatprep.subr.bf16.mxu1 %v2230_v22  ;;  %v568_v22 = vld [vmem:[#allocation2 + $0xeb0] sm:$0xff] }
 0x189   :  { %v2260_v26 = vpack.c.bf16 %v568_v22, %v564_v21  ;;  %v2356_v21 = vpack.c.bf16 %v1489_v16, %v1487_v15  ;;  %v1521_v4 = vld [vmem:[#allocation7 + $0x350] sm:$0xff]  ;;  %v1527_v15 = vld [vmem:[#allocation7 + $0x380] sm:$0xff] }
 0x18a   :  { %v1529_v16 = vld [vmem:[#allocation7 + $0x390] sm:$0xff] }
 0x18b   :  { %2233 = vmatpush1.bf16.msra.mxu1 %v2232_v63  ;;  %v572_v63 = vld [vmem:[#allocation2 + $0xed0] sm:$0xff] }
 0x18c   :  { %2235 = vmatprep.subr.bf16.mxu1 %v2234_v27  ;;  %v576_v27 = vld [vmem:[#allocation2 + $0xef0] sm:$0xff] }
 0x18d   :  { %v2264_v29 = vpack.c.bf16 %v576_v27, %v572_v63  ;;  %v2360_v63 = vpack.c.bf16 %v1493_v25, %v1491_v24  ;;  %v1531_v24 = vld [vmem:[#allocation7 + $0x3a0] sm:$0xff]  ;;  %v1533_v25 = vld [vmem:[#allocation7 + $0x3b0] sm:$0xff] }
 0x18f   :  { %2237 = vmatpush1.bf16.msra.mxu1 %v2236_v31  ;;  %v580_v31 = vld [vmem:[#allocation2 + $0xf10] sm:$0xff] }
 0x190   :  { %2239 = vmatprep.subr.bf16.mxu1 %v2238_v32  ;;  %v584_v32 = vld [vmem:[#allocation2 + $0xf30] sm:$0xff] }
 0x191   :  { %v883_v44 = vpop.f32.mrb[2].mxu1  ;;  %v2268_v34 = vpack.c.bf16 %v584_v32, %v580_v31  ;;  %v2364_v31 = vpack.c.bf16 %v1497_v12, %v1495_v18  ;;  %v1535_v18 = vld [vmem:[#allocation7 + $0x3c0] sm:$0xff]  ;;  %v1537_v12 = vld [vmem:[#allocation7 + $0x3d0] sm:$0xff] }
 0x192   :  { %v2742_v48 = vadd.f32 %v883_v44, %v2735_v13  ;;  %v885_v49 = vpop.f32.mrb[3].mxu1  ;;  %v553_v13 = vld [vmem:[#allocation2 + $0xe38] sm:$0xff] }
 0x193   :  { %v2745_v50 = vadd.f32 %v885_v49, %v2737_v19  ;;  %2241 = vmatpush1.bf16.msra.mxu1 %v2240_v36  ;;  %v2250_v19 = vpack.c.bf16 %v553_v13, %v549_v61  ;;  %v588_v36 = vld [vmem:[#allocation2 + $0xf50] sm:$0xff]  ;;  %v609_v44 = vld [vmem:[#allocation2 + $0xff8] sm:$0xff] }
 0x194   :  { %2243 = vmatprep.subr.bf16.mxu1 %v2242_v39  ;;  %v2272_v39 = vpack.c.bf16 %v592_v37, %v588_v36  ;;  %v2278_v46 = vpack.c.bf16 %v609_v44, %v605_v43  ;;  %v608_v49 = vld [vmem:[#allocation2 + $0xff0] sm:$0xff]  ;;  %v2368_v36 = vpack.c.bf16 %v1501_v33, %v1499_v28  ;;  %v1507_v43 = vld [vmem:[#allocation7 + $0x2e0] sm:$0xff] }
 0x195   :  { %v1509_v44 = vld [vmem:[#allocation7 + $0x2f0] sm:$0xff]  ;;  %v1539_v28 = vld [vmem:[#allocation7 + $0x3e0] sm:$0xff] }
 0x196   :  { %v1541_v33 = vld [vmem:[#allocation7 + $0x3f0] sm:$0xff] }
 0x197   :  { %2245 = vmatpush1.bf16.msra.mxu1 %v2244_v51  ;;  %v2280_v51 = vpack.c.bf16 %v608_v49, %v604_v47  ;;  %v2376_v47 = vpack.c.bf16 %v1509_v44, %v1507_v43  ;;  %v1543_v44 = vld [vmem:[#allocation9] sm:$0x3] }
 0x198   :  { %2247 = vmatprep.subr.bf16.mxu1 %v2246_v56  ;;  %v2751_v56 = vld [vmem:[#allocation6] sm:$0xf] }
 0x199   :  { %v1390_v58 = vrot.slane %v2751_v56, %v1389_v55  ;;  %v1394_v60 = vrot.slane %v2751_v56, %v1393_v57 }
 0x19b   :  { %2249 = vmatpush1.bf16.msra.mxu1 %v2248_v0  ;;  %v1479_v0 = vld [vmem:[#allocation7 + $0x200] sm:$0xff] }
 0x19c   :  { %2251 = vmatprep.subr.bf16.mxu1 %v2250_v19  ;;  %v1481_v19 = vld [vmem:[#allocation7 + $0x210] sm:$0xff] }
 0x19d   :  { %v2348_v6 = vpack.c.bf16 %v1481_v19, %v1479_v0  ;;  %v1522_v0 = vld [vmem:[#allocation7 + $0x358] sm:$0xff] }
 0x19f   :  { %2253 = vmatpush1.bf16.msra.mxu1 %v2252_v9  ;;  %v1483_v9 = vld [vmem:[#allocation7 + $0x220] sm:$0xff] }
 0x1a0   :  { %2255 = vmatprep.subr.bf16.mxu1 %v2254_v10  ;;  %v1485_v10 = vld [vmem:[#allocation7 + $0x230] sm:$0xff] }
 0x1a3   :  { %2257 = vmatpush1.bf16.msra.mxu1 %v2256_v17  ;;  %v1492_v17 = vld [vmem:[#allocation7 + $0x268] sm:$0xff] }
 0x1a4   :  { %2259 = vmatprep.subr.bf16.mxu1 %v2258_v20  ;;  %v1494_v20 = vld [vmem:[#allocation7 + $0x278] sm:$0xff] }
 0x1a5   :  { %v2358_v22 = vpack.c.bf16 %v1494_v20, %v1492_v17  ;;  %v1532_v17 = vld [vmem:[#allocation7 + $0x3a8] sm:$0xff]  ;;  %v1534_v20 = vld [vmem:[#allocation7 + $0x3b8] sm:$0xff] }
 0x1a7   :  { %2261 = vmatpush1.bf16.msra.mxu1 %v2260_v26  ;;  %v1496_v26 = vld [vmem:[#allocation7 + $0x288] sm:$0xff] }
 0x1a8   :  { %2263 = vmatprep.subr.bf16.mxu1 %v2262_v52  ;;  %v1498_v52 = vld [vmem:[#allocation7 + $0x298] sm:$0xff] }
 0x1a9   :  { %v2362_v27 = vpack.c.bf16 %v1498_v52, %v1496_v26  ;;  %v1536_v26 = vld [vmem:[#allocation7 + $0x3c8] sm:$0xff]  ;;  %v1538_v52 = vld [vmem:[#allocation7 + $0x3d8] sm:$0xff] }
 0x1ab   :  { %2265 = vmatpush1.bf16.msra.mxu1 %v2264_v29  ;;  %v1500_v29 = vld [vmem:[#allocation7 + $0x2a8] sm:$0xff] }
 0x1ac   :  { %2267 = vmatprep.subr.bf16.mxu1 %v2266_v30  ;;  %v1502_v30 = vld [vmem:[#allocation7 + $0x2b8] sm:$0xff] }
 0x1ad   :  { %v2366_v32 = vpack.c.bf16 %v1502_v30, %v1500_v29  ;;  %v1540_v29 = vld [vmem:[#allocation7 + $0x3e8] sm:$0xff]  ;;  %v1542_v30 = vld [vmem:[#allocation7 + $0x3f8] sm:$0xff] }
 0x1af   :  { %2269 = vmatpush1.bf16.msra.mxu1 %v2268_v34  ;;  %v1504_v34 = vld [vmem:[#allocation7 + $0x2c8] sm:$0xff] }
 0x1b0   :  { %2271 = vmatprep.subr.bf16.mxu1 %v2270_v35  ;;  %v1506_v35 = vld [vmem:[#allocation7 + $0x2d8] sm:$0xff] }
 0x1b1   :  { %v2370_v37 = vpack.c.bf16 %v1506_v35, %v1504_v34  ;;  %v2408_v34 = vpack.c.bf16 %v1541_v33, %v1539_v28  ;;  %v1397_v35 = vsub.s32 2, %v2748_v54 }
 0x1b3   :  { %2273 = vmatpush1.bf16.msra.mxu1 %v2272_v39  ;;  %v1508_v39 = vld [vmem:[#allocation7 + $0x2e8] sm:$0xff] }
 0x1b4   :  { %2275 = vmatprep.subr.bf16.mxu1 %v2274_v40  ;;  %v1510_v40 = vld [vmem:[#allocation7 + $0x2f8] sm:$0xff] }
 0x1b5   :  { %v2374_v42 = vpack.c.bf16 %v1510_v40, %v1508_v39 }
 0x1b7   :  { %2277 = vmatpush1.bf16.msra.mxu1 %v2276_v45  ;;  %v1512_v45 = vld [vmem:[#allocation7 + $0x308] sm:$0xff] }
 0x1b8   :  { %2279 = vmatprep.subr.bf16.mxu1 %v2278_v46  ;;  %v1514_v46 = vld [vmem:[#allocation7 + $0x318] sm:$0xff] }
 0x1b9   :  { %v2378_v49 = vpack.c.bf16 %v1514_v46, %v1512_v45  ;;  %v1548_v45 = vrot.slane %v1543_v44, %v1389_v55  ;;  %v1552_v46 = vrot.slane %v1543_v44, %v1393_v57 }
 0x1bb   :  { %2281 = vmatpush1.bf16.msra.mxu1 %v2280_v51  ;;  %v1511_v51 = vld [vmem:[#allocation7 + $0x300] sm:$0xff] }
 0x1be   :  { %1379 = vmatmul.mubr.f32.vlgmr.msra.gmra.mrb[0].mxu1 %v2728_v2 }
 0x210   :  { %v1096_v59 = vpop.f32.mrb[2].mxu0 }
 0x211   :  { %v2411_v2 = vadd.f32 %v1096_v59, %v2742_v48  ;;  %v1098_v61 = vpop.f32.mrb[3].mxu0  ;;  %v2352_v48 = vpack.c.bf16 %v1485_v10, %v1483_v9  ;;  %v1518_v59 = vld [vmem:[#allocation7 + $0x338] sm:$0xff]  ;;  %v1523_v9 = vld [vmem:[#allocation7 + $0x360] sm:$0xff]  ;;  %v1525_v10 = vld [vmem:[#allocation7 + $0x370] sm:$0xff] }
 0x212   :  { %v2413_v13 = vadd.f32 %v1098_v61, %v2745_v50  ;;  %v2354_v50 = vpack.c.bf16 %v1490_v14, %v1488_v11  ;;  %v1515_v61 = vld [vmem:[#allocation7 + $0x320] sm:$0xff]  ;;  %v1528_v11 = vld [vmem:[#allocation7 + $0x388] sm:$0xff]  ;;  %v1530_v14 = vld [vmem:[#allocation7 + $0x398] sm:$0xff] }
 0x213   :  { %v1407_v62 = vadd.f32 %v2411_v2, %v1390_v58  ;;  %v1516_v58 = vld [vmem:[#allocation7 + $0x328] sm:$0xff] }
 0x214   :  { %v1408_v1 = vadd.f32 %v2413_v13, %v1394_v60  ;;  %v2380_v60 = vpack.c.bf16 %v1513_v53, %v1511_v51  ;;  %v2382_v2 = vpack.c.bf16 %v1518_v59, %v1516_v58  ;;  %v1517_v13 = vld [vmem:[#allocation7 + $0x330] sm:$0xff] }
 0x215   :  { %v1411_v7 = vmax.f32 %v1407_v62, 0.0  ;;  %v1520_v62 = vld [vmem:[#allocation7 + $0x348] sm:$0xff]  ;;  %v2384_v19 = vpack.c.bf16 %v1517_v13, %v1515_v61 }
 0x216   :  { %v1412_v5 = vmax.f32 %v1408_v1, 0.0  ;;  %v2386_v1 = vpack.c.bf16 %v1522_v0, %v1520_v62 }
 0x218   :  { %1619 = vmatprep.mubr.f32.mxu0 %v1412_v5  ;;  %v1524_v5 = vld [vmem:[#allocation7 + $0x368] sm:$0xff] }
 0x219   :  { %1620 = vmatmul.mubr.f32.vlgmr.msra.gmra.mrb[4].mxu0 %v1411_v7  ;;  %v2388_v7 = vpack.c.bf16 %v1521_v4, %v1519_v3 }
 0x21a   :  { %2349 = vmatpush1.bf16.msra.mxu0 %v2348_v6  ;;  %v1526_v6 = vld [vmem:[#allocation7 + $0x378] sm:$0xff] }
 0x21b   :  { %2351 = vmatprep.subr.bf16.mxu0 %v2350_v8  ;;  %v2390_v8 = vpack.c.bf16 %v1526_v6, %v1524_v5 }
 0x21e   :  { %2353 = vmatpush1.bf16.msra.mxu0 %v2352_v48  ;;  %v2392_v48 = vpack.c.bf16 %v1525_v10, %v1523_v9 }
 0x21f   :  { %2355 = vmatprep.subr.bf16.mxu0 %v2354_v50  ;;  %v2394_v50 = vpack.c.bf16 %v1530_v14, %v1528_v11 }
 0x222   :  { %2357 = vmatpush1.bf16.msra.mxu0 %v2356_v21  ;;  %v2396_v21 = vpack.c.bf16 %v1529_v16, %v1527_v15 }
 0x223   :  { %2359 = vmatprep.subr.bf16.mxu0 %v2358_v22  ;;  %v2398_v22 = vpack.c.bf16 %v1534_v20, %v1532_v17 }
 0x226   :  { %2361 = vmatpush1.bf16.msra.mxu0 %v2360_v63  ;;  %v2400_v63 = vpack.c.bf16 %v1533_v25, %v1531_v24 }
 0x227   :  { %2363 = vmatprep.subr.bf16.mxu0 %v2362_v27  ;;  %v2402_v27 = vpack.c.bf16 %v1538_v52, %v1536_v26 }
 0x22a   :  { %2365 = vmatpush1.bf16.msra.mxu0 %v2364_v31  ;;  %v2404_v31 = vpack.c.bf16 %v1537_v12, %v1535_v18 }
 0x22b   :  { %2367 = vmatprep.subr.bf16.mxu0 %v2366_v32  ;;  %v2406_v32 = vpack.c.bf16 %v1542_v30, %v1540_v29 }
 0x22e   :  { %2369 = vmatpush1.bf16.msra.mxu0 %v2368_v36  ;;  %v1401_v36 = vsub.s32 3, %v2748_v54 }
 0x22f   :  { %2371 = vmatprep.subr.bf16.mxu0 %v2370_v37  ;;  %v1398_v37 = vrot.slane %v2751_v56, %v1397_v35 }
 0x230   :  { %v1402_v38 = vrot.slane %v2751_v56, %v1401_v36 }
 0x232   :  { %2373 = vmatpush1.bf16.msra.mxu0 %v2372_v41 }
 0x233   :  { %2375 = vmatprep.subr.bf16.mxu0 %v2374_v42 }
 0x236   :  { %2377 = vmatpush1.bf16.msra.mxu0 %v2376_v47 }
 0x237   :  { %2379 = vmatprep.subr.bf16.mxu0 %v2378_v49 }
 0x23a   :  { %2381 = vmatpush1.bf16.msra.mxu0 %v2380_v60 }
 0x23b   :  { %2383 = vmatprep.subr.bf16.mxu0 %v2382_v2 }
 0x23e   :  { %2385 = vmatpush1.bf16.msra.mxu0 %v2384_v19 }
 0x23f   :  { %2387 = vmatprep.subr.bf16.mxu0 %v2386_v1 }
 0x242   :  { %2389 = vmatpush1.bf16.msra.mxu0 %v2388_v7 }
 0x243   :  { %2391 = vmatprep.subr.bf16.mxu0 %v2390_v8 }
 0x246   :  { %2393 = vmatpush1.bf16.msra.mxu0 %v2392_v48 }
 0x247   :  { %2395 = vmatprep.subr.bf16.mxu0 %v2394_v50 }
 0x24a   :  { %2397 = vmatpush1.bf16.msra.mxu0 %v2396_v21 }
 0x24b   :  { %2399 = vmatprep.subr.bf16.mxu0 %v2398_v22 }
 0x24e   :  { %2401 = vmatpush1.bf16.msra.mxu0 %v2400_v63 }
 0x24f   :  { %2403 = vmatprep.subr.bf16.mxu0 %v2402_v27 }
 0x252   :  { %2405 = vmatpush1.bf16.msra.mxu0 %v2404_v31 }
 0x253   :  { %2407 = vmatprep.subr.bf16.mxu0 %v2406_v32 }
 0x256   :  { %2409 = vmatpush1.bf16.msra.mxu0 %v2408_v34 }
 0x291   :  { %v1380_v23 = vpop.f32.mrb[0].mxu1 }
 0x292   :  { %v1409_v39 = vadd.f32 %v1398_v37, %v1380_v23  ;;  %v1382_v40 = vpop.f32.mrb[1].mxu1 }
 0x293   :  { %v1410_v41 = vadd.f32 %v1402_v38, %v1382_v40 }
 0x294   :  { %v1413_v43 = vmax.f32 %v1409_v39, 0.0 }
 0x295   :  { %v1414_v42 = vmax.f32 %v1410_v41, 0.0 }
 0x297   :  { %1690 = vmatprep.mubr.f32.mxu0 %v1414_v42 }
 0x298   :  { %1691 = vmatmul.mubr.f32.vlgmr.msra.gmra.mrb[4].mxu0 %v1413_v43 }
 0x36b   :  { %v1692_v47 = vpop.f32.mrb[4].mxu0 }
 0x36c   :  { %v2414_v49 = vadd.f32 %v1692_v47, %v1548_v45  ;;  %v1694_v51 = vpop.f32.mrb[5].mxu0 }
 0x36d   :  { %v2415_v53 = vadd.f32 %v1694_v51, %v1552_v46 }
 0x36e   :  { %1697 = vst [vmem:[%s2783_s7] sm:$0xff] %v2414_v49 }
 0x36f   :  { %1698 = vst [vmem:[%s2783_s7 + $0x8] sm:$0xff] %v2415_v53 }
 0x370   :  { %1703 = vsyncpa [#allocation3], 1 }
 0x371   :  { %1704 = vsyncpa [#allocation5], 1 }
 0x372   :  { %1705 = vsyncpa [#allocation8], 1 }

</bundles_post_ra>
